<compile_context>
chip_gen: v5e
topology: v5e:2x2
jax: 0.10.0
libtpu: 0.0.40
codegen_flags: <defaults>
</compile_context>

<pallas_src>
import functools

import jax
import jax.numpy as jnp
from jax.experimental import pallas as pl
from jax.experimental.pallas import tpu as pltpu


_VMEM = pl.BlockSpec(memory_space=pltpu.MemorySpace.VMEM)


# ----------------------------- weight slab layout ----------------------------

def _slab_layout(D, H, M):
    """Row layout of the packed (rows, 4H) weight slab. Every piece starts on an
    8-row (sublane) boundary so static in-kernel slices are aligned."""
    def r8(n):
        return ((n + 7) // 8) * 8
    order = [
        ("wih_tw", D),        # per-tweet LSTM W_ih^T
        ("whh_bd", 2 * H),    # row-stacked [W_hh_tweet^T ; W_hh_desc^T] (block via h packing)
        ("b_tw", 1),          # b_ih + b_hh (per-tweet LSTM)
        ("wih_d", D),         # description LSTM W_ih^T
        ("b_d", 1),
        ("wih_tt_h", H),      # twtlstm W_ih^T, hidden half (concat folded away)
        ("wih_tt_m", M),      # twtlstm W_ih^T, tweet-meta half
        ("whh_tt", H),        # twtlstm W_hh^T
        ("b_tt", 1),
        ("fc", 1),            # [wfc_twt | wfc_acc | wfc_desc | fc1_bias | 0...]
    ]
    lay, off = {}, 0
    for name, rows in order:
        lay[name] = (off, rows)
        off += r8(rows)
    return lay, off


# ----------------------------- fused Pallas kernel ---------------------------

def _dm_fused_kernel(
    tweets_ref,   # (T*N, D)  time-major flattened tweet words
    lens_ref,     # (N, 1)    int32 true word counts per tweet
    tmeta_ref,    # (N, M)
    desc_ref,     # (Td, D)
    acc_ref,      # (1, A)
    w_ref,        # (rows, 4H) packed weight slab
    out_ref,      # (1, 1)
    gx_scr,       # VMEM scratch (Tmax, B, 4H): staged input projections
    *, H, N, T, Td):
    f32 = jnp.float32
    G = 4 * H
    Tmax = gx_scr.shape[0]
    B = gx_scr.shape[1]                 # padded recurrence rows (>= N+1, multiple of 8)
    D = tweets_ref.shape[1]
    M = tmeta_ref.shape[1]
    A = acc_ref.shape[1]

    lay, _ = _slab_layout(D, H, M)

    def w(name):
        off, rows = lay[name]
        return w_ref[off:off + rows, :]     # static, 8-aligned slice -> free

    # --- prologue: hoisted input projections, 2 matmuls total, staged in VMEM
    gx_tw = jnp.dot(tweets_ref[...], w("wih_tw"),
                    preferred_element_type=f32) + w("b_tw")        # (T*N, 4H)
    gx_d = jnp.dot(desc_ref[...], w("wih_d"),
                   preferred_element_type=f32) + w("b_d")          # (Td, 4H)

    pad_rows = B - N - 1
    zpad = jnp.zeros((pad_rows, G), f32) if pad_rows else None
    for t in range(Tmax):
        tt = min(t, T - 1)                  # clamped; frozen rows ignore stale gx
        td = min(t, Td - 1)
        parts = [gx_tw[tt * N:(tt + 1) * N, :], gx_d[td:td + 1, :]]
        if pad_rows:
            parts.append(zpad)
        gx_scr[t] = jnp.concatenate(parts, axis=0)                 # (B, 4H)

    # --- fused (tweet-batch || description) recurrence ------------------------
    # Rows 0..N-1: per-tweet LSTM (shared weights, batched). Row N: description
    # LSTM. Hidden packed as [h_tw | 0] / [0 | h_d] so ONE (B,2H)@(2H,4H) dot per
    # step serves both weight sets. Ragged tweets freeze (h,c) once t >= len;
    # the description row freezes at t >= Td; padded rows stay zero.
    whh_bd = w("whh_bd")                                           # (2H, 4H)
    row = jax.lax.broadcasted_iota(jnp.int32, (B, 1), 0)
    m_tw = (row < N).astype(f32)
    m_d = (row == N).astype(f32)
    lens_parts = [lens_ref[...], jnp.full((1, 1), Td, jnp.int32)]
    if pad_rows:
        lens_parts.append(jnp.zeros((pad_rows, 1), jnp.int32))
    lens = jnp.concatenate(lens_parts, axis=0)                     # (B, 1)

    h = jnp.zeros((B, H), f32)
    c = jnp.zeros((B, H), f32)
    for t in range(Tmax):
        gxb = gx_scr[t]                                            # one aligned vreg load
        hp = jnp.concatenate([h * m_tw, h * m_d], axis=1)          # (B, 2H) block packing
        gates = gxb + jnp.dot(hp, whh_bd, preferred_element_type=f32)
        sig = jax.nn.sigmoid(gates)      # ONE full-lane sigmoid (i, f, o)
        tnh = jnp.tanh(gates)            # ONE full-lane tanh (g)
        c_new = sig[:, H:2 * H] * c + sig[:, 0:H] * tnh[:, 2 * H:3 * H]
        h_new = sig[:, 3 * H:4 * H] * jnp.tanh(c_new)
        live = lens > t
        h = jnp.where(live, h_new, h)
        c = jnp.where(live, c_new, c)

    tweet_h = h[0:N, :]                                            # (N, H)
    desc_h = h[N:N + 1, :]                                         # (1, H)

    # --- tweet-level LSTM over REVERSED (tweet_h | tweetsmeta) rows (batch 1) --
    # The concat is folded into the input projection via the split W_ih halves.
    gx_tt = (jnp.dot(tweet_h, w("wih_tt_h"), preferred_element_type=f32)
             + jnp.dot(tmeta_ref[...], w("wih_tt_m"), preferred_element_type=f32)
             + w("b_tt"))                                          # (N, 4H), hoisted
    whh_tt = w("whh_tt")
    h2 = jnp.zeros((1, H), f32)
    c2 = jnp.zeros((1, H), f32)
    for s in range(N):
        r = N - 1 - s                                              # reversed order
        gates = gx_tt[r:r + 1, :] + jnp.dot(h2, whh_tt, preferred_element_type=f32)
        sig = jax.nn.sigmoid(gates)
        tnh = jnp.tanh(gates)
        c2 = sig[:, H:2 * H] * c2 + sig[:, 0:H] * tnh[:, 2 * H:3 * H]
        h2 = sig[:, 3 * H:4 * H] * jnp.tanh(c2)

    # --- fc1 + sigmoid: one lane-dense multiply + one reduce (bias folded) ----
    feat = jnp.concatenate([h2, acc_ref[...], desc_h, jnp.ones((1, 1), f32)], axis=1)
    wrow = w("fc")[:, :2 * H + A + 1]
    z = jnp.sum(feat * wrow, axis=-1, keepdims=True)
    out_ref[...] = jax.nn.sigmoid(z)


# ----------------------------- params & wrappers -----------------------------

def init_lstm_params(key, input_size, hidden_size):
    """Deterministic init matching PyTorch LSTM's U(-1/sqrt(H), 1/sqrt(H)) scale."""
    k = 1.0 / float(hidden_size) ** 0.5
    k1, k2, k3, k4 = jax.random.split(key, 4)
    return dict(
        w_ih=jax.random.uniform(k1, (4 * hidden_size, input_size), jnp.float32, -k, k),
        w_hh=jax.random.uniform(k2, (4 * hidden_size, hidden_size), jnp.float32, -k, k),
        b_ih=jax.random.uniform(k3, (4 * hidden_size,), jnp.float32, -k, k),
        b_hh=jax.random.uniform(k4, (4 * hidden_size,), jnp.float32, -k, k),
    )


def prep_dm_params(raw):
    """One-time layout prep: transpose W_ih/W_hh, fold b_ih+b_hh, stack the two
    independent W_hh's for the block-packed recurrence, split twtlstm W_ih
    (hidden|meta), fold the fc1 bias into its weight row, and pack EVERYTHING
    into a single (rows, 4H) f32 slab -> one weight DMA per forward call."""
    H = raw["tweet"]["w_hh"].shape[1]
    D = raw["tweet"]["w_ih"].shape[1]
    M = raw["twt"]["w_ih"].shape[1] - H
    G = 4 * H

    def fold(p):
        wih_t = jnp.asarray(p["w_ih"], jnp.float32).T            # (in, 4H)
        whh_t = jnp.asarray(p["w_hh"], jnp.float32).T            # (H, 4H)
        b = (jnp.asarray(p["b_ih"], jnp.float32)
             + jnp.asarray(p["b_hh"], jnp.float32)).reshape(1, G)
        return wih_t, whh_t, b

    wih_tw_t, whh_tw_t, b_tw = fold(raw["tweet"])
    wih_tt_t, whh_tt_t, b_tt = fold(raw["twt"])
    wih_d_t, whh_d_t, b_d = fold(raw["description"])

    wfc = jnp.asarray(raw["fc1_w"], jnp.float32).reshape(-1)     # (2H + A,)
    A = int(wfc.shape[0]) - 2 * H
    assert 2 * H + A + 1 <= G, "fc1 row (+ folded bias) must fit in 4H lanes"
    fc_row = jnp.zeros((1, G), jnp.float32)
    fc_row = fc_row.at[0, :2 * H + A].set(wfc)
    fc_row = fc_row.at[0, 2 * H + A].set(jnp.asarray(raw["fc1_b"], jnp.float32).reshape(-1)[0])

    pieces = {
        "wih_tw": wih_tw_t,
        "whh_bd": jnp.concatenate([whh_tw_t, whh_d_t], axis=0),  # (2H, 4H)
        "b_tw": b_tw,
        "wih_d": wih_d_t,
        "b_d": b_d,
        "wih_tt_h": wih_tt_t[:H, :],
        "wih_tt_m": wih_tt_t[H:, :],
        "whh_tt": whh_tt_t,
        "b_tt": b_tt,
        "fc": fc_row,
    }
    lay, total_rows = _slab_layout(D, H, M)
    slab = jnp.zeros((total_rows, G), jnp.float32)
    for name, arr in pieces.items():
        off, rows = lay[name]
        assert arr.shape == (rows, G), (name, arr.shape)
        slab = slab.at[off:off + rows, :].set(arr)
    return slab


@jax.jit
def dm_forward(slab, tweets_tm, tweet_lens, tweetsmeta, accountdescription, accountmeta):
    """Eval-mode DM.forward (bothsidelstm=1, samemodelfornontweet=1,
    partiallyclose=[], dropout=identity) as ONE fused Pallas kernel.

    slab:               packed weight slab from prep_dm_params
    tweets_tm:          (T, N, D)  TIME-major padded tweet batch
    tweet_lens:         (N,)       true word count of each tweet
    tweetsmeta:         (N, M)
    accountdescription: (Td, D)
    accountmeta:        (A,)
    returns:            (1,) = sigmoid(fc1(cat(twtout, accountmeta, descout)))
    """
    T, N, D = tweets_tm.shape
    Td = accountdescription.shape[0]
    A = int(accountmeta.size)
    H = slab.shape[1] // 4
    Tmax = max(T, Td)
    B_pad = ((N + 1 + 7) // 8) * 8

    # metadata-only reshapes / no-op casts: no extra XLA compute in front of the kernel
    tweets_flat = tweets_tm.astype(jnp.float32).reshape(T * N, D)
    lens_col = tweet_lens.astype(jnp.int32).reshape(N, 1)
    acc_row = accountmeta.astype(jnp.float32).reshape(1, A)

    kern = functools.partial(_dm_fused_kernel, H=H, N=N, T=T, Td=Td)
    out = pl.pallas_call(
        kern,
        out_shape=jax.ShapeDtypeStruct((1, 1), jnp.float32),
        in_specs=[_VMEM] * 6,
        out_specs=_VMEM,
        scratch_shapes=[pltpu.VMEM((Tmax, B_pad, 4 * H), jnp.float32)],
    )(tweets_flat, lens_col, tweetsmeta.astype(jnp.float32),
      accountdescription.astype(jnp.float32), acc_row, slab)
    return out.reshape(1)


# ----------------------------- pure-JAX reference ----------------------------

def _lstm_ref(x_seq, lens, w_ih, w_hh, b_ih, b_hh):
    H = w_hh.shape[1]
    T, B, _ = x_seq.shape
    h = jnp.zeros((B, H), jnp.float32)
    c = jnp.zeros((B, H), jnp.float32)
    for t in range(T):
        gates = x_seq[t] @ w_ih.T + h @ w_hh.T + b_ih + b_hh
        i = jax.nn.sigmoid(gates[:, 0:H])
        f = jax.nn.sigmoid(gates[:, H:2 * H])
        g = jnp.tanh(gates[:, 2 * H:3 * H])
        o = jax.nn.sigmoid(gates[:, 3 * H:4 * H])
        c_new = f * c + i * g
        h_new = o * jnp.tanh(c_new)
        if lens is None:
            h, c = h_new, c_new
        else:
            m = (lens > t)[:, None]
            h = jnp.where(m, h_new, h)
            c = jnp.where(m, c_new, c)
    return h


def dm_forward_ref(raw, tweets, tweet_lens, tweetsmeta, desc, accountmeta):
    p = raw["description"]
    desc_h = _lstm_ref(desc[:, None, :], None, p["w_ih"], p["w_hh"], p["b_ih"], p["b_hh"])
    p = raw["tweet"]
    tw_h = _lstm_ref(jnp.transpose(tweets, (1, 0, 2)), tweet_lens,
                     p["w_ih"], p["w_hh"], p["b_ih"], p["b_hh"])
    lstmout = jnp.concatenate([tw_h, tweetsmeta], axis=1)
    p = raw["twt"]
    twt_h = _lstm_ref(lstmout[::-1][:, None, :], None,
                      p["w_ih"], p["w_hh"], p["b_ih"], p["b_hh"])
    feat = jnp.concatenate([twt_h.reshape(-1), accountmeta.reshape(-1), desc_h.reshape(-1)])
    z = feat @ raw["fc1_w"].reshape(-1) + raw["fc1_b"][0]
    return jax.nn.sigmoid(z).reshape(1)


# ----------------------------- main -------------------------------------------

if __name__ == "__main__":
    # small shapes consistent with the module
    D = 32      # inpsize (word embedding size)
    H = 32      # hiddensize
    N = 4       # numberoftweets available
    T = 8       # max words per tweet (padded)
    M = 16      # tweetmetasize
    A = 31      # accountmetasize
    Td = 8      # words in account description

    key = jax.random.PRNGKey(0)
    keys = jax.random.split(key, 9)

    raw_params = {
        "tweet": init_lstm_params(keys[0], D, H),          # shared by all per-tweet LSTMs
        "twt": init_lstm_params(keys[1], H + M, H),        # twtlstm
        "description": init_lstm_params(keys[2], D, H),    # descriptionlstm
        "fc1_w": jax.random.uniform(keys[3], (1, 2 * H + A), jnp.float32, -0.1, 0.1),
        "fc1_b": jax.random.uniform(keys[4], (1,), jnp.float32, -0.1, 0.1),
    }
    slab = prep_dm_params(raw_params)

    tweets = jax.random.normal(keys[5], (N, T, D), jnp.float32)     # batch-first
    tweets_tm = jnp.transpose(tweets, (1, 0, 2))                    # time-major, built once at ingest
    tweet_lens = jnp.array([T, T - 2, T, T - 3], jnp.int32)         # ragged tweet lengths
    tweetsmeta = jax.random.normal(keys[6], (N, M), jnp.float32)
    accountdescription = jax.random.normal(keys[7], (Td, D), jnp.float32)
    accountmeta = jax.random.normal(keys[8], (A,), jnp.float32)

    out = dm_forward(slab, tweets_tm, tweet_lens, tweetsmeta,
                     accountdescription, accountmeta)
    out = jax.block_until_ready(out)

    ref = dm_forward_ref(raw_params, tweets, tweet_lens, tweetsmeta,
                         accountdescription, accountmeta)

    assert out.shape == (1,)
    assert jnp.allclose(out, ref, atol=1e-4, rtol=1e-4), (out, ref)
    assert jnp.all((out >= 0.0) & (out <= 1.0))
    print("KERNEL_OK")
</pallas_src>

<mosaic_0001>
module attributes {stable_mosaic.version = 11 : i64} {
  func.func @_dm_fused_kernel(%arg0: memref<32x32xf32, #tpu.memory_space<vmem>>, %arg1: memref<4x1xi32, #tpu.memory_space<vmem>>, %arg2: memref<4x16xf32, #tpu.memory_space<vmem>>, %arg3: memref<8x32xf32, #tpu.memory_space<vmem>>, %arg4: memref<1x31xf32, #tpu.memory_space<vmem>>, %arg5: memref<240x128xf32, #tpu.memory_space<vmem>>, %arg6: memref<1x1xf32, #tpu.memory_space<vmem>>, %arg7: memref<8x8x128xf32, #tpu.memory_space<vmem>>) attributes {dimension_semantics = [], scalar_prefetch = 0 : i64, scratch_operands = 1 : i64, tpu.core_type = #tpu.core_type<tc>} {
    %c0 = arith.constant 0 : index
    %c0_0 = arith.constant 0 : index
    %0 = vector.load %arg0[%c0, %c0_0] : memref<32x32xf32, #tpu.memory_space<vmem>>, vector<32x32xf32>
    %c0_1 = arith.constant 0 : index
    %c0_2 = arith.constant 0 : index
    %1 = vector.load %arg5[%c0_1, %c0_2] : memref<240x128xf32, #tpu.memory_space<vmem>>, vector<32x128xf32>
    %cst = arith.constant dense<0.000000e+00> : vector<32x128xf32>
    %2 = tpu.matmul %0, %1, %cst {dimension_numbers = #tpu.dot_dimension_numbers<[1], [0], [0], [1], [0, 0, 1, 1], [], []>} : vector<32x32xf32>, vector<32x128xf32>, vector<32x128xf32> -> vector<32x128xf32>
    %c96 = arith.constant 96 : index
    %c0_3 = arith.constant 0 : index
    %3 = vector.load %arg5[%c96, %c0_3] : memref<240x128xf32, #tpu.memory_space<vmem>>, vector<1x128xf32>
    %4 = vector.broadcast %3 : vector<1x128xf32> to vector<32x128xf32>
    %5 = arith.addf %2, %4 : vector<32x128xf32>
    %c0_4 = arith.constant 0 : index
    %c0_5 = arith.constant 0 : index
    %6 = vector.load %arg3[%c0_4, %c0_5] : memref<8x32xf32, #tpu.memory_space<vmem>>, vector<8x32xf32>
    %c104 = arith.constant 104 : index
    %c0_6 = arith.constant 0 : index
    %7 = vector.load %arg5[%c104, %c0_6] : memref<240x128xf32, #tpu.memory_space<vmem>>, vector<32x128xf32>
    %cst_7 = arith.constant dense<0.000000e+00> : vector<8x128xf32>
    %8 = tpu.matmul %6, %7, %cst_7 {dimension_numbers = #tpu.dot_dimension_numbers<[1], [0], [0], [1], [0, 0, 1, 1], [], []>} : vector<8x32xf32>, vector<32x128xf32>, vector<8x128xf32> -> vector<8x128xf32>
    %c136 = arith.constant 136 : index
    %c0_8 = arith.constant 0 : index
    %9 = vector.load %arg5[%c136, %c0_8] : memref<240x128xf32, #tpu.memory_space<vmem>>, vector<1x128xf32>
    %10 = vector.broadcast %9 : vector<1x128xf32> to vector<8x128xf32>
    %11 = arith.addf %8, %10 : vector<8x128xf32>
    %cst_9 = arith.constant 0.000000e+00 : f32
    %12 = vector.broadcast %cst_9 : f32 to vector<3x128xf32>
    %13 = vector.extract_strided_slice %5 {offsets = [0, 0], sizes = [4, 128], strides = [1, 1]} : vector<32x128xf32> to vector<4x128xf32>
    %14 = vector.extract_strided_slice %11 {offsets = [0, 0], sizes = [1, 128], strides = [1, 1]} : vector<8x128xf32> to vector<1x128xf32>
    %15 = tpu.concatenate %13, %14, %12 in 0 : vector<4x128xf32>, vector<1x128xf32>, vector<3x128xf32> -> vector<8x128xf32>
    %c0_10 = arith.constant 0 : index
    %c0_11 = arith.constant 0 : index
    %c0_12 = arith.constant 0 : index
    %16 = vector.load %arg7[%c0_10, %c0_11, %c0_12] : memref<8x8x128xf32, #tpu.memory_space<vmem>>, vector<1x8x128xf32>
    %17 = vector.shape_cast %16 : vector<1x8x128xf32> to vector<8x128xf32>
    %18 = vector.shape_cast %15 : vector<8x128xf32> to vector<1x8x128xf32>
    tpu.vector_store %arg7[%c0_10, %c0_11, %c0_12], %18 {strides = array<i32>} : memref<8x8x128xf32, #tpu.memory_space<vmem>>, vector<1x8x128xf32>,
    %19 = vector.extract_strided_slice %5 {offsets = [4, 0], sizes = [4, 128], strides = [1, 1]} : vector<32x128xf32> to vector<4x128xf32>
    %20 = vector.extract_strided_slice %11 {offsets = [1, 0], sizes = [1, 128], strides = [1, 1]} : vector<8x128xf32> to vector<1x128xf32>
    %21 = tpu.concatenate %19, %20, %12 in 0 : vector<4x128xf32>, vector<1x128xf32>, vector<3x128xf32> -> vector<8x128xf32>
    %c1 = arith.constant 1 : index
    %c0_13 = arith.constant 0 : index
    %c0_14 = arith.constant 0 : index
    %22 = vector.load %arg7[%c1, %c0_13, %c0_14] : memref<8x8x128xf32, #tpu.memory_space<vmem>>, vector<1x8x128xf32>
    %23 = vector.shape_cast %22 : vector<1x8x128xf32> to vector<8x128xf32>
    %24 = vector.shape_cast %21 : vector<8x128xf32> to vector<1x8x128xf32>
    tpu.vector_store %arg7[%c1, %c0_13, %c0_14], %24 {strides = array<i32>} : memref<8x8x128xf32, #tpu.memory_space<vmem>>, vector<1x8x128xf32>,
    %25 = vector.extract_strided_slice %5 {offsets = [8, 0], sizes = [4, 128], strides = [1, 1]} : vector<32x128xf32> to vector<4x128xf32>
    %26 = vector.extract_strided_slice %11 {offsets = [2, 0], sizes = [1, 128], strides = [1, 1]} : vector<8x128xf32> to vector<1x128xf32>
    %27 = tpu.concatenate %25, %26, %12 in 0 : vector<4x128xf32>, vector<1x128xf32>, vector<3x128xf32> -> vector<8x128xf32>
    %c2 = arith.constant 2 : index
    %c0_15 = arith.constant 0 : index
    %c0_16 = arith.constant 0 : index
    %28 = vector.load %arg7[%c2, %c0_15, %c0_16] : memref<8x8x128xf32, #tpu.memory_space<vmem>>, vector<1x8x128xf32>
    %29 = vector.shape_cast %28 : vector<1x8x128xf32> to vector<8x128xf32>
    %30 = vector.shape_cast %27 : vector<8x128xf32> to vector<1x8x128xf32>
    tpu.vector_store %arg7[%c2, %c0_15, %c0_16], %30 {strides = array<i32>} : memref<8x8x128xf32, #tpu.memory_space<vmem>>, vector<1x8x128xf32>,
    %31 = vector.extract_strided_slice %5 {offsets = [12, 0], sizes = [4, 128], strides = [1, 1]} : vector<32x128xf32> to vector<4x128xf32>
    %32 = vector.extract_strided_slice %11 {offsets = [3, 0], sizes = [1, 128], strides = [1, 1]} : vector<8x128xf32> to vector<1x128xf32>
    %33 = tpu.concatenate %31, %32, %12 in 0 : vector<4x128xf32>, vector<1x128xf32>, vector<3x128xf32> -> vector<8x128xf32>
    %c3 = arith.constant 3 : index
    %c0_17 = arith.constant 0 : index
    %c0_18 = arith.constant 0 : index
    %34 = vector.load %arg7[%c3, %c0_17, %c0_18] : memref<8x8x128xf32, #tpu.memory_space<vmem>>, vector<1x8x128xf32>
    %35 = vector.shape_cast %34 : vector<1x8x128xf32> to vector<8x128xf32>
    %36 = vector.shape_cast %33 : vector<8x128xf32> to vector<1x8x128xf32>
    tpu.vector_store %arg7[%c3, %c0_17, %c0_18], %36 {strides = array<i32>} : memref<8x8x128xf32, #tpu.memory_space<vmem>>, vector<1x8x128xf32>,
    %37 = vector.extract_strided_slice %5 {offsets = [16, 0], sizes = [4, 128], strides = [1, 1]} : vector<32x128xf32> to vector<4x128xf32>
    %38 = vector.extract_strided_slice %11 {offsets = [4, 0], sizes = [1, 128], strides = [1, 1]} : vector<8x128xf32> to vector<1x128xf32>
    %39 = tpu.concatenate %37, %38, %12 in 0 : vector<4x128xf32>, vector<1x128xf32>, vector<3x128xf32> -> vector<8x128xf32>
    %c4 = arith.constant 4 : index
    %c0_19 = arith.constant 0 : index
    %c0_20 = arith.constant 0 : index
    %40 = vector.load %arg7[%c4, %c0_19, %c0_20] : memref<8x8x128xf32, #tpu.memory_space<vmem>>, vector<1x8x128xf32>
    %41 = vector.shape_cast %40 : vector<1x8x128xf32> to vector<8x128xf32>
    %42 = vector.shape_cast %39 : vector<8x128xf32> to vector<1x8x128xf32>
    tpu.vector_store %arg7[%c4, %c0_19, %c0_20], %42 {strides = array<i32>} : memref<8x8x128xf32, #tpu.memory_space<vmem>>, vector<1x8x128xf32>,
    %43 = vector.extract_strided_slice %5 {offsets = [20, 0], sizes = [4, 128], strides = [1, 1]} : vector<32x128xf32> to vector<4x128xf32>
    %44 = vector.extract_strided_slice %11 {offsets = [5, 0], sizes = [1, 128], strides = [1, 1]} : vector<8x128xf32> to vector<1x128xf32>
    %45 = tpu.concatenate %43, %44, %12 in 0 : vector<4x128xf32>, vector<1x128xf32>, vector<3x128xf32> -> vector<8x128xf32>
    %c5 = arith.constant 5 : index
    %c0_21 = arith.constant 0 : index
    %c0_22 = arith.constant 0 : index
    %46 = vector.load %arg7[%c5, %c0_21, %c0_22] : memref<8x8x128xf32, #tpu.memory_space<vmem>>, vector<1x8x128xf32>
    %47 = vector.shape_cast %46 : vector<1x8x128xf32> to vector<8x128xf32>
    %48 = vector.shape_cast %45 : vector<8x128xf32> to vector<1x8x128xf32>
    tpu.vector_store %arg7[%c5, %c0_21, %c0_22], %48 {strides = array<i32>} : memref<8x8x128xf32, #tpu.memory_space<vmem>>, vector<1x8x128xf32>,
    %49 = vector.extract_strided_slice %5 {offsets = [24, 0], sizes = [4, 128], strides = [1, 1]} : vector<32x128xf32> to vector<4x128xf32>
    %50 = vector.extract_strided_slice %11 {offsets = [6, 0], sizes = [1, 128], strides = [1, 1]} : vector<8x128xf32> to vector<1x128xf32>
    %51 = tpu.concatenate %49, %50, %12 in 0 : vector<4x128xf32>, vector<1x128xf32>, vector<3x128xf32> -> vector<8x128xf32>
    %c6 = arith.constant 6 : index
    %c0_23 = arith.constant 0 : index
    %c0_24 = arith.constant 0 : index
    %52 = vector.load %arg7[%c6, %c0_23, %c0_24] : memref<8x8x128xf32, #tpu.memory_space<vmem>>, vector<1x8x128xf32>
    %53 = vector.shape_cast %52 : vector<1x8x128xf32> to vector<8x128xf32>
    %54 = vector.shape_cast %51 : vector<8x128xf32> to vector<1x8x128xf32>
    tpu.vector_store %arg7[%c6, %c0_23, %c0_24], %54 {strides = array<i32>} : memref<8x8x128xf32, #tpu.memory_space<vmem>>, vector<1x8x128xf32>,
    %55 = vector.extract_strided_slice %5 {offsets = [28, 0], sizes = [4, 128], strides = [1, 1]} : vector<32x128xf32> to vector<4x128xf32>
    %56 = vector.extract_strided_slice %11 {offsets = [7, 0], sizes = [1, 128], strides = [1, 1]} : vector<8x128xf32> to vector<1x128xf32>
    %57 = tpu.concatenate %55, %56, %12 in 0 : vector<4x128xf32>, vector<1x128xf32>, vector<3x128xf32> -> vector<8x128xf32>
    %c7 = arith.constant 7 : index
    %c0_25 = arith.constant 0 : index
    %c0_26 = arith.constant 0 : index
    %58 = vector.load %arg7[%c7, %c0_25, %c0_26] : memref<8x8x128xf32, #tpu.memory_space<vmem>>, vector<1x8x128xf32>
    %59 = vector.shape_cast %58 : vector<1x8x128xf32> to vector<8x128xf32>
    %60 = vector.shape_cast %57 : vector<8x128xf32> to vector<1x8x128xf32>
    tpu.vector_store %arg7[%c7, %c0_25, %c0_26], %60 {strides = array<i32>} : memref<8x8x128xf32, #tpu.memory_space<vmem>>, vector<1x8x128xf32>,
    %c32 = arith.constant 32 : index
    %c0_27 = arith.constant 0 : index
    %61 = vector.load %arg5[%c32, %c0_27] : memref<240x128xf32, #tpu.memory_space<vmem>>, vector<64x128xf32>
    %62 = tpu.iota {dimensions = array<i32: 0>} : vector<8x1xi32>
    %c4_i32 = arith.constant 4 : i32
    %63 = vector.broadcast %c4_i32 : i32 to vector<8x1xi32>
    %64 = arith.cmpi slt, %62, %63 : vector<8x1xi32>
    %65 = arith.extui %64 : vector<8x1xi1> to vector<8x1xi32>
    %66 = arith.sitofp %65 : vector<8x1xi32> to vector<8x1xf32>
    %c4_i32_28 = arith.constant 4 : i32
    %67 = vector.broadcast %c4_i32_28 : i32 to vector<8x1xi32>
    %68 = arith.cmpi eq, %62, %67 : vector<8x1xi32>
    %69 = arith.extui %68 : vector<8x1xi1> to vector<8x1xi32>
    %70 = arith.sitofp %69 : vector<8x1xi32> to vector<8x1xf32>
    %c0_29 = arith.constant 0 : index
    %c0_30 = arith.constant 0 : index
    %71 = vector.load %arg1[%c0_29, %c0_30] : memref<4x1xi32, #tpu.memory_space<vmem>>, vector<4x1xi32>
    %c8_i32 = arith.constant 8 : i32
    %72 = vector.broadcast %c8_i32 : i32 to vector<1x1xi32>
    %c0_i32 = arith.constant 0 : i32
    %73 = vector.broadcast %c0_i32 : i32 to vector<3x1xi32>
    %74 = tpu.concatenate %71, %72, %73 in 0 : vector<4x1xi32>, vector<1x1xi32>, vector<3x1xi32> -> vector<8x1xi32>
    %cst_31 = arith.constant 0.000000e+00 : f32
    %75 = vector.broadcast %cst_31 : f32 to vector<8x32xf32>
    %cst_32 = arith.constant 0.000000e+00 : f32
    %76 = vector.broadcast %cst_32 : f32 to vector<8x32xf32>
    %c0_33 = arith.constant 0 : index
    %c0_34 = arith.constant 0 : index
    %c0_35 = arith.constant 0 : index
    %77 = vector.load %arg7[%c0_33, %c0_34, %c0_35] : memref<8x8x128xf32, #tpu.memory_space<vmem>>, vector<1x8x128xf32>
    %78 = vector.shape_cast %77 : vector<1x8x128xf32> to vector<8x128xf32>
    %79 = vector.broadcast %66 : vector<8x1xf32> to vector<8x32xf32>
    %80 = arith.mulf %75, %79 : vector<8x32xf32>
    %81 = vector.broadcast %70 : vector<8x1xf32> to vector<8x32xf32>
    %82 = arith.mulf %75, %81 : vector<8x32xf32>
    %83 = tpu.concatenate %80, %82 in 1 : vector<8x32xf32>, vector<8x32xf32> -> vector<8x64xf32>
    %cst_36 = arith.constant dense<0.000000e+00> : vector<8x128xf32>
    %84 = tpu.matmul %83, %61, %cst_36 {dimension_numbers = #tpu.dot_dimension_numbers<[1], [0], [0], [1], [0, 0, 1, 1], [], []>} : vector<8x64xf32>, vector<64x128xf32>, vector<8x128xf32> -> vector<8x128xf32>
    %85 = arith.addf %78, %84 : vector<8x128xf32>
    %86 = arith.negf %85 : vector<8x128xf32>
    %87 = math.exp %86 : vector<8x128xf32>
    %cst_37 = arith.constant 1.000000e+00 : f32
    %88 = vector.broadcast %cst_37 : f32 to vector<8x128xf32>
    %89 = arith.addf %88, %87 : vector<8x128xf32>
    %90 = arith.divf %88, %89 : vector<8x128xf32>
    %91 = math.tanh %85 : vector<8x128xf32>
    %92 = vector.extract_strided_slice %90 {offsets = [0, 32], sizes = [8, 32], strides = [1, 1]} : vector<8x128xf32> to vector<8x32xf32>
    %93 = arith.mulf %92, %76 : vector<8x32xf32>
    %94 = vector.extract_strided_slice %90 {offsets = [0, 0], sizes = [8, 32], strides = [1, 1]} : vector<8x128xf32> to vector<8x32xf32>
    %95 = vector.extract_strided_slice %91 {offsets = [0, 64], sizes = [8, 32], strides = [1, 1]} : vector<8x128xf32> to vector<8x32xf32>
    %96 = arith.mulf %94, %95 : vector<8x32xf32>
    %97 = arith.addf %93, %96 : vector<8x32xf32>
    %98 = vector.extract_strided_slice %90 {offsets = [0, 96], sizes = [8, 32], strides = [1, 1]} : vector<8x128xf32> to vector<8x32xf32>
    %99 = math.tanh %97 : vector<8x32xf32>
    %100 = arith.mulf %98, %99 : vector<8x32xf32>
    %c0_i32_38 = arith.constant 0 : i32
    %101 = vector.broadcast %c0_i32_38 : i32 to vector<8x1xi32>
    %102 = arith.cmpi sgt, %74, %101 : vector<8x1xi32>
    %103 = vector.shape_cast %102 : vector<8x1xi1> to vector<8x1xi1>
    %104 = vector.broadcast %103 : vector<8x1xi1> to vector<8x32xi1>
    %105 = arith.select %104, %100, %75 : vector<8x32xi1>, vector<8x32xf32>
    %106 = vector.shape_cast %102 : vector<8x1xi1> to vector<8x1xi1>
    %107 = vector.broadcast %106 : vector<8x1xi1> to vector<8x32xi1>
    %108 = arith.select %107, %97, %76 : vector<8x32xi1>, vector<8x32xf32>
    %c1_39 = arith.constant 1 : index
    %c0_40 = arith.constant 0 : index
    %c0_41 = arith.constant 0 : index
    %109 = vector.load %arg7[%c1_39, %c0_40, %c0_41] : memref<8x8x128xf32, #tpu.memory_space<vmem>>, vector<1x8x128xf32>
    %110 = vector.shape_cast %109 : vector<1x8x128xf32> to vector<8x128xf32>
    %111 = vector.broadcast %66 : vector<8x1xf32> to vector<8x32xf32>
    %112 = arith.mulf %105, %111 : vector<8x32xf32>
    %113 = vector.broadcast %70 : vector<8x1xf32> to vector<8x32xf32>
    %114 = arith.mulf %105, %113 : vector<8x32xf32>
    %115 = tpu.concatenate %112, %114 in 1 : vector<8x32xf32>, vector<8x32xf32> -> vector<8x64xf32>
    %cst_42 = arith.constant dense<0.000000e+00> : vector<8x128xf32>
    %116 = tpu.matmul %115, %61, %cst_42 {dimension_numbers = #tpu.dot_dimension_numbers<[1], [0], [0], [1], [0, 0, 1, 1], [], []>} : vector<8x64xf32>, vector<64x128xf32>, vector<8x128xf32> -> vector<8x128xf32>
    %117 = arith.addf %110, %116 : vector<8x128xf32>
    %118 = arith.negf %117 : vector<8x128xf32>
    %119 = math.exp %118 : vector<8x128xf32>
    %cst_43 = arith.constant 1.000000e+00 : f32
    %120 = vector.broadcast %cst_43 : f32 to vector<8x128xf32>
    %121 = arith.addf %120, %119 : vector<8x128xf32>
    %122 = arith.divf %120, %121 : vector<8x128xf32>
    %123 = math.tanh %117 : vector<8x128xf32>
    %124 = vector.extract_strided_slice %122 {offsets = [0, 32], sizes = [8, 32], strides = [1, 1]} : vector<8x128xf32> to vector<8x32xf32>
    %125 = arith.mulf %124, %108 : vector<8x32xf32>
    %126 = vector.extract_strided_slice %122 {offsets = [0, 0], sizes = [8, 32], strides = [1, 1]} : vector<8x128xf32> to vector<8x32xf32>
    %127 = vector.extract_strided_slice %123 {offsets = [0, 64], sizes = [8, 32], strides = [1, 1]} : vector<8x128xf32> to vector<8x32xf32>
    %128 = arith.mulf %126, %127 : vector<8x32xf32>
    %129 = arith.addf %125, %128 : vector<8x32xf32>
    %130 = vector.extract_strided_slice %122 {offsets = [0, 96], sizes = [8, 32], strides = [1, 1]} : vector<8x128xf32> to vector<8x32xf32>
    %131 = math.tanh %129 : vector<8x32xf32>
    %132 = arith.mulf %130, %131 : vector<8x32xf32>
    %c1_i32 = arith.constant 1 : i32
    %133 = vector.broadcast %c1_i32 : i32 to vector<8x1xi32>
    %134 = arith.cmpi sgt, %74, %133 : vector<8x1xi32>
    %135 = vector.shape_cast %134 : vector<8x1xi1> to vector<8x1xi1>
    %136 = vector.broadcast %135 : vector<8x1xi1> to vector<8x32xi1>
    %137 = arith.select %136, %132, %105 : vector<8x32xi1>, vector<8x32xf32>
    %138 = vector.shape_cast %134 : vector<8x1xi1> to vector<8x1xi1>
    %139 = vector.broadcast %138 : vector<8x1xi1> to vector<8x32xi1>
    %140 = arith.select %139, %129, %108 : vector<8x32xi1>, vector<8x32xf32>
    %c2_44 = arith.constant 2 : index
    %c0_45 = arith.constant 0 : index
    %c0_46 = arith.constant 0 : index
    %141 = vector.load %arg7[%c2_44, %c0_45, %c0_46] : memref<8x8x128xf32, #tpu.memory_space<vmem>>, vector<1x8x128xf32>
    %142 = vector.shape_cast %141 : vector<1x8x128xf32> to vector<8x128xf32>
    %143 = vector.broadcast %66 : vector<8x1xf32> to vector<8x32xf32>
    %144 = arith.mulf %137, %143 : vector<8x32xf32>
    %145 = vector.broadcast %70 : vector<8x1xf32> to vector<8x32xf32>
    %146 = arith.mulf %137, %145 : vector<8x32xf32>
    %147 = tpu.concatenate %144, %146 in 1 : vector<8x32xf32>, vector<8x32xf32> -> vector<8x64xf32>
    %cst_47 = arith.constant dense<0.000000e+00> : vector<8x128xf32>
    %148 = tpu.matmul %147, %61, %cst_47 {dimension_numbers = #tpu.dot_dimension_numbers<[1], [0], [0], [1], [0, 0, 1, 1], [], []>} : vector<8x64xf32>, vector<64x128xf32>, vector<8x128xf32> -> vector<8x128xf32>
    %149 = arith.addf %142, %148 : vector<8x128xf32>
    %150 = arith.negf %149 : vector<8x128xf32>
    %151 = math.exp %150 : vector<8x128xf32>
    %cst_48 = arith.constant 1.000000e+00 : f32
    %152 = vector.broadcast %cst_48 : f32 to vector<8x128xf32>
    %153 = arith.addf %152, %151 : vector<8x128xf32>
    %154 = arith.divf %152, %153 : vector<8x128xf32>
    %155 = math.tanh %149 : vector<8x128xf32>
    %156 = vector.extract_strided_slice %154 {offsets = [0, 32], sizes = [8, 32], strides = [1, 1]} : vector<8x128xf32> to vector<8x32xf32>
    %157 = arith.mulf %156, %140 : vector<8x32xf32>
    %158 = vector.extract_strided_slice %154 {offsets = [0, 0], sizes = [8, 32], strides = [1, 1]} : vector<8x128xf32> to vector<8x32xf32>
    %159 = vector.extract_strided_slice %155 {offsets = [0, 64], sizes = [8, 32], strides = [1, 1]} : vector<8x128xf32> to vector<8x32xf32>
    %160 = arith.mulf %158, %159 : vector<8x32xf32>
    %161 = arith.addf %157, %160 : vector<8x32xf32>
    %162 = vector.extract_strided_slice %154 {offsets = [0, 96], sizes = [8, 32], strides = [1, 1]} : vector<8x128xf32> to vector<8x32xf32>
    %163 = math.tanh %161 : vector<8x32xf32>
    %164 = arith.mulf %162, %163 : vector<8x32xf32>
    %c2_i32 = arith.constant 2 : i32
    %165 = vector.broadcast %c2_i32 : i32 to vector<8x1xi32>
    %166 = arith.cmpi sgt, %74, %165 : vector<8x1xi32>
    %167 = vector.shape_cast %166 : vector<8x1xi1> to vector<8x1xi1>
    %168 = vector.broadcast %167 : vector<8x1xi1> to vector<8x32xi1>
    %169 = arith.select %168, %164, %137 : vector<8x32xi1>, vector<8x32xf32>
    %170 = vector.shape_cast %166 : vector<8x1xi1> to vector<8x1xi1>
    %171 = vector.broadcast %170 : vector<8x1xi1> to vector<8x32xi1>
    %172 = arith.select %171, %161, %140 : vector<8x32xi1>, vector<8x32xf32>
    %c3_49 = arith.constant 3 : index
    %c0_50 = arith.constant 0 : index
    %c0_51 = arith.constant 0 : index
    %173 = vector.load %arg7[%c3_49, %c0_50, %c0_51] : memref<8x8x128xf32, #tpu.memory_space<vmem>>, vector<1x8x128xf32>
    %174 = vector.shape_cast %173 : vector<1x8x128xf32> to vector<8x128xf32>
    %175 = vector.broadcast %66 : vector<8x1xf32> to vector<8x32xf32>
    %176 = arith.mulf %169, %175 : vector<8x32xf32>
    %177 = vector.broadcast %70 : vector<8x1xf32> to vector<8x32xf32>
    %178 = arith.mulf %169, %177 : vector<8x32xf32>
    %179 = tpu.concatenate %176, %178 in 1 : vector<8x32xf32>, vector<8x32xf32> -> vector<8x64xf32>
    %cst_52 = arith.constant dense<0.000000e+00> : vector<8x128xf32>
    %180 = tpu.matmul %179, %61, %cst_52 {dimension_numbers = #tpu.dot_dimension_numbers<[1], [0], [0], [1], [0, 0, 1, 1], [], []>} : vector<8x64xf32>, vector<64x128xf32>, vector<8x128xf32> -> vector<8x128xf32>
    %181 = arith.addf %174, %180 : vector<8x128xf32>
    %182 = arith.negf %181 : vector<8x128xf32>
    %183 = math.exp %182 : vector<8x128xf32>
    %cst_53 = arith.constant 1.000000e+00 : f32
    %184 = vector.broadcast %cst_53 : f32 to vector<8x128xf32>
    %185 = arith.addf %184, %183 : vector<8x128xf32>
    %186 = arith.divf %184, %185 : vector<8x128xf32>
    %187 = math.tanh %181 : vector<8x128xf32>
    %188 = vector.extract_strided_slice %186 {offsets = [0, 32], sizes = [8, 32], strides = [1, 1]} : vector<8x128xf32> to vector<8x32xf32>
    %189 = arith.mulf %188, %172 : vector<8x32xf32>
    %190 = vector.extract_strided_slice %186 {offsets = [0, 0], sizes = [8, 32], strides = [1, 1]} : vector<8x128xf32> to vector<8x32xf32>
    %191 = vector.extract_strided_slice %187 {offsets = [0, 64], sizes = [8, 32], strides = [1, 1]} : vector<8x128xf32> to vector<8x32xf32>
    %192 = arith.mulf %190, %191 : vector<8x32xf32>
    %193 = arith.addf %189, %192 : vector<8x32xf32>
    %194 = vector.extract_strided_slice %186 {offsets = [0, 96], sizes = [8, 32], strides = [1, 1]} : vector<8x128xf32> to vector<8x32xf32>
    %195 = math.tanh %193 : vector<8x32xf32>
    %196 = arith.mulf %194, %195 : vector<8x32xf32>
    %c3_i32 = arith.constant 3 : i32
    %197 = vector.broadcast %c3_i32 : i32 to vector<8x1xi32>
    %198 = arith.cmpi sgt, %74, %197 : vector<8x1xi32>
    %199 = vector.shape_cast %198 : vector<8x1xi1> to vector<8x1xi1>
    %200 = vector.broadcast %199 : vector<8x1xi1> to vector<8x32xi1>
    %201 = arith.select %200, %196, %169 : vector<8x32xi1>, vector<8x32xf32>
    %202 = vector.shape_cast %198 : vector<8x1xi1> to vector<8x1xi1>
    %203 = vector.broadcast %202 : vector<8x1xi1> to vector<8x32xi1>
    %204 = arith.select %203, %193, %172 : vector<8x32xi1>, vector<8x32xf32>
    %c4_54 = arith.constant 4 : index
    %c0_55 = arith.constant 0 : index
    %c0_56 = arith.constant 0 : index
    %205 = vector.load %arg7[%c4_54, %c0_55, %c0_56] : memref<8x8x128xf32, #tpu.memory_space<vmem>>, vector<1x8x128xf32>
    %206 = vector.shape_cast %205 : vector<1x8x128xf32> to vector<8x128xf32>
    %207 = vector.broadcast %66 : vector<8x1xf32> to vector<8x32xf32>
    %208 = arith.mulf %201, %207 : vector<8x32xf32>
    %209 = vector.broadcast %70 : vector<8x1xf32> to vector<8x32xf32>
    %210 = arith.mulf %201, %209 : vector<8x32xf32>
    %211 = tpu.concatenate %208, %210 in 1 : vector<8x32xf32>, vector<8x32xf32> -> vector<8x64xf32>
    %cst_57 = arith.constant dense<0.000000e+00> : vector<8x128xf32>
    %212 = tpu.matmul %211, %61, %cst_57 {dimension_numbers = #tpu.dot_dimension_numbers<[1], [0], [0], [1], [0, 0, 1, 1], [], []>} : vector<8x64xf32>, vector<64x128xf32>, vector<8x128xf32> -> vector<8x128xf32>
    %213 = arith.addf %206, %212 : vector<8x128xf32>
    %214 = arith.negf %213 : vector<8x128xf32>
    %215 = math.exp %214 : vector<8x128xf32>
    %cst_58 = arith.constant 1.000000e+00 : f32
    %216 = vector.broadcast %cst_58 : f32 to vector<8x128xf32>
    %217 = arith.addf %216, %215 : vector<8x128xf32>
    %218 = arith.divf %216, %217 : vector<8x128xf32>
    %219 = math.tanh %213 : vector<8x128xf32>
    %220 = vector.extract_strided_slice %218 {offsets = [0, 32], sizes = [8, 32], strides = [1, 1]} : vector<8x128xf32> to vector<8x32xf32>
    %221 = arith.mulf %220, %204 : vector<8x32xf32>
    %222 = vector.extract_strided_slice %218 {offsets = [0, 0], sizes = [8, 32], strides = [1, 1]} : vector<8x128xf32> to vector<8x32xf32>
    %223 = vector.extract_strided_slice %219 {offsets = [0, 64], sizes = [8, 32], strides = [1, 1]} : vector<8x128xf32> to vector<8x32xf32>
    %224 = arith.mulf %222, %223 : vector<8x32xf32>
    %225 = arith.addf %221, %224 : vector<8x32xf32>
    %226 = vector.extract_strided_slice %218 {offsets = [0, 96], sizes = [8, 32], strides = [1, 1]} : vector<8x128xf32> to vector<8x32xf32>
    %227 = math.tanh %225 : vector<8x32xf32>
    %228 = arith.mulf %226, %227 : vector<8x32xf32>
    %c4_i32_59 = arith.constant 4 : i32
    %229 = vector.broadcast %c4_i32_59 : i32 to vector<8x1xi32>
    %230 = arith.cmpi sgt, %74, %229 : vector<8x1xi32>
    %231 = vector.shape_cast %230 : vector<8x1xi1> to vector<8x1xi1>
    %232 = vector.broadcast %231 : vector<8x1xi1> to vector<8x32xi1>
    %233 = arith.select %232, %228, %201 : vector<8x32xi1>, vector<8x32xf32>
    %234 = vector.shape_cast %230 : vector<8x1xi1> to vector<8x1xi1>
    %235 = vector.broadcast %234 : vector<8x1xi1> to vector<8x32xi1>
    %236 = arith.select %235, %225, %204 : vector<8x32xi1>, vector<8x32xf32>
    %c5_60 = arith.constant 5 : index
    %c0_61 = arith.constant 0 : index
    %c0_62 = arith.constant 0 : index
    %237 = vector.load %arg7[%c5_60, %c0_61, %c0_62] : memref<8x8x128xf32, #tpu.memory_space<vmem>>, vector<1x8x128xf32>
    %238 = vector.shape_cast %237 : vector<1x8x128xf32> to vector<8x128xf32>
    %239 = vector.broadcast %66 : vector<8x1xf32> to vector<8x32xf32>
    %240 = arith.mulf %233, %239 : vector<8x32xf32>
    %241 = vector.broadcast %70 : vector<8x1xf32> to vector<8x32xf32>
    %242 = arith.mulf %233, %241 : vector<8x32xf32>
    %243 = tpu.concatenate %240, %242 in 1 : vector<8x32xf32>, vector<8x32xf32> -> vector<8x64xf32>
    %cst_63 = arith.constant dense<0.000000e+00> : vector<8x128xf32>
    %244 = tpu.matmul %243, %61, %cst_63 {dimension_numbers = #tpu.dot_dimension_numbers<[1], [0], [0], [1], [0, 0, 1, 1], [], []>} : vector<8x64xf32>, vector<64x128xf32>, vector<8x128xf32> -> vector<8x128xf32>
    %245 = arith.addf %238, %244 : vector<8x128xf32>
    %246 = arith.negf %245 : vector<8x128xf32>
    %247 = math.exp %246 : vector<8x128xf32>
    %cst_64 = arith.constant 1.000000e+00 : f32
    %248 = vector.broadcast %cst_64 : f32 to vector<8x128xf32>
    %249 = arith.addf %248, %247 : vector<8x128xf32>
    %250 = arith.divf %248, %249 : vector<8x128xf32>
    %251 = math.tanh %245 : vector<8x128xf32>
    %252 = vector.extract_strided_slice %250 {offsets = [0, 32], sizes = [8, 32], strides = [1, 1]} : vector<8x128xf32> to vector<8x32xf32>
    %253 = arith.mulf %252, %236 : vector<8x32xf32>
    %254 = vector.extract_strided_slice %250 {offsets = [0, 0], sizes = [8, 32], strides = [1, 1]} : vector<8x128xf32> to vector<8x32xf32>
    %255 = vector.extract_strided_slice %251 {offsets = [0, 64], sizes = [8, 32], strides = [1, 1]} : vector<8x128xf32> to vector<8x32xf32>
    %256 = arith.mulf %254, %255 : vector<8x32xf32>
    %257 = arith.addf %253, %256 : vector<8x32xf32>
    %258 = vector.extract_strided_slice %250 {offsets = [0, 96], sizes = [8, 32], strides = [1, 1]} : vector<8x128xf32> to vector<8x32xf32>
    %259 = math.tanh %257 : vector<8x32xf32>
    %260 = arith.mulf %258, %259 : vector<8x32xf32>
    %c5_i32 = arith.constant 5 : i32
    %261 = vector.broadcast %c5_i32 : i32 to vector<8x1xi32>
    %262 = arith.cmpi sgt, %74, %261 : vector<8x1xi32>
    %263 = vector.shape_cast %262 : vector<8x1xi1> to vector<8x1xi1>
    %264 = vector.broadcast %263 : vector<8x1xi1> to vector<8x32xi1>
    %265 = arith.select %264, %260, %233 : vector<8x32xi1>, vector<8x32xf32>
    %266 = vector.shape_cast %262 : vector<8x1xi1> to vector<8x1xi1>
    %267 = vector.broadcast %266 : vector<8x1xi1> to vector<8x32xi1>
    %268 = arith.select %267, %257, %236 : vector<8x32xi1>, vector<8x32xf32>
    %c6_65 = arith.constant 6 : index
    %c0_66 = arith.constant 0 : index
    %c0_67 = arith.constant 0 : index
    %269 = vector.load %arg7[%c6_65, %c0_66, %c0_67] : memref<8x8x128xf32, #tpu.memory_space<vmem>>, vector<1x8x128xf32>
    %270 = vector.shape_cast %269 : vector<1x8x128xf32> to vector<8x128xf32>
    %271 = vector.broadcast %66 : vector<8x1xf32> to vector<8x32xf32>
    %272 = arith.mulf %265, %271 : vector<8x32xf32>
    %273 = vector.broadcast %70 : vector<8x1xf32> to vector<8x32xf32>
    %274 = arith.mulf %265, %273 : vector<8x32xf32>
    %275 = tpu.concatenate %272, %274 in 1 : vector<8x32xf32>, vector<8x32xf32> -> vector<8x64xf32>
    %cst_68 = arith.constant dense<0.000000e+00> : vector<8x128xf32>
    %276 = tpu.matmul %275, %61, %cst_68 {dimension_numbers = #tpu.dot_dimension_numbers<[1], [0], [0], [1], [0, 0, 1, 1], [], []>} : vector<8x64xf32>, vector<64x128xf32>, vector<8x128xf32> -> vector<8x128xf32>
    %277 = arith.addf %270, %276 : vector<8x128xf32>
    %278 = arith.negf %277 : vector<8x128xf32>
    %279 = math.exp %278 : vector<8x128xf32>
    %cst_69 = arith.constant 1.000000e+00 : f32
    %280 = vector.broadcast %cst_69 : f32 to vector<8x128xf32>
    %281 = arith.addf %280, %279 : vector<8x128xf32>
    %282 = arith.divf %280, %281 : vector<8x128xf32>
    %283 = math.tanh %277 : vector<8x128xf32>
    %284 = vector.extract_strided_slice %282 {offsets = [0, 32], sizes = [8, 32], strides = [1, 1]} : vector<8x128xf32> to vector<8x32xf32>
    %285 = arith.mulf %284, %268 : vector<8x32xf32>
    %286 = vector.extract_strided_slice %282 {offsets = [0, 0], sizes = [8, 32], strides = [1, 1]} : vector<8x128xf32> to vector<8x32xf32>
    %287 = vector.extract_strided_slice %283 {offsets = [0, 64], sizes = [8, 32], strides = [1, 1]} : vector<8x128xf32> to vector<8x32xf32>
    %288 = arith.mulf %286, %287 : vector<8x32xf32>
    %289 = arith.addf %285, %288 : vector<8x32xf32>
    %290 = vector.extract_strided_slice %282 {offsets = [0, 96], sizes = [8, 32], strides = [1, 1]} : vector<8x128xf32> to vector<8x32xf32>
    %291 = math.tanh %289 : vector<8x32xf32>
    %292 = arith.mulf %290, %291 : vector<8x32xf32>
    %c6_i32 = arith.constant 6 : i32
    %293 = vector.broadcast %c6_i32 : i32 to vector<8x1xi32>
    %294 = arith.cmpi sgt, %74, %293 : vector<8x1xi32>
    %295 = vector.shape_cast %294 : vector<8x1xi1> to vector<8x1xi1>
    %296 = vector.broadcast %295 : vector<8x1xi1> to vector<8x32xi1>
    %297 = arith.select %296, %292, %265 : vector<8x32xi1>, vector<8x32xf32>
    %298 = vector.shape_cast %294 : vector<8x1xi1> to vector<8x1xi1>
    %299 = vector.broadcast %298 : vector<8x1xi1> to vector<8x32xi1>
    %300 = arith.select %299, %289, %268 : vector<8x32xi1>, vector<8x32xf32>
    %c7_70 = arith.constant 7 : index
    %c0_71 = arith.constant 0 : index
    %c0_72 = arith.constant 0 : index
    %301 = vector.load %arg7[%c7_70, %c0_71, %c0_72] : memref<8x8x128xf32, #tpu.memory_space<vmem>>, vector<1x8x128xf32>
    %302 = vector.shape_cast %301 : vector<1x8x128xf32> to vector<8x128xf32>
    %303 = vector.broadcast %66 : vector<8x1xf32> to vector<8x32xf32>
    %304 = arith.mulf %297, %303 : vector<8x32xf32>
    %305 = vector.broadcast %70 : vector<8x1xf32> to vector<8x32xf32>
    %306 = arith.mulf %297, %305 : vector<8x32xf32>
    %307 = tpu.concatenate %304, %306 in 1 : vector<8x32xf32>, vector<8x32xf32> -> vector<8x64xf32>
    %cst_73 = arith.constant dense<0.000000e+00> : vector<8x128xf32>
    %308 = tpu.matmul %307, %61, %cst_73 {dimension_numbers = #tpu.dot_dimension_numbers<[1], [0], [0], [1], [0, 0, 1, 1], [], []>} : vector<8x64xf32>, vector<64x128xf32>, vector<8x128xf32> -> vector<8x128xf32>
    %309 = arith.addf %302, %308 : vector<8x128xf32>
    %310 = arith.negf %309 : vector<8x128xf32>
    %311 = math.exp %310 : vector<8x128xf32>
    %cst_74 = arith.constant 1.000000e+00 : f32
    %312 = vector.broadcast %cst_74 : f32 to vector<8x128xf32>
    %313 = arith.addf %312, %311 : vector<8x128xf32>
    %314 = arith.divf %312, %313 : vector<8x128xf32>
    %315 = math.tanh %309 : vector<8x128xf32>
    %316 = vector.extract_strided_slice %314 {offsets = [0, 32], sizes = [8, 32], strides = [1, 1]} : vector<8x128xf32> to vector<8x32xf32>
    %317 = arith.mulf %316, %300 : vector<8x32xf32>
    %318 = vector.extract_strided_slice %314 {offsets = [0, 0], sizes = [8, 32], strides = [1, 1]} : vector<8x128xf32> to vector<8x32xf32>
    %319 = vector.extract_strided_slice %315 {offsets = [0, 64], sizes = [8, 32], strides = [1, 1]} : vector<8x128xf32> to vector<8x32xf32>
    %320 = arith.mulf %318, %319 : vector<8x32xf32>
    %321 = arith.addf %317, %320 : vector<8x32xf32>
    %322 = vector.extract_strided_slice %314 {offsets = [0, 96], sizes = [8, 32], strides = [1, 1]} : vector<8x128xf32> to vector<8x32xf32>
    %323 = math.tanh %321 : vector<8x32xf32>
    %324 = arith.mulf %322, %323 : vector<8x32xf32>
    %c7_i32 = arith.constant 7 : i32
    %325 = vector.broadcast %c7_i32 : i32 to vector<8x1xi32>
    %326 = arith.cmpi sgt, %74, %325 : vector<8x1xi32>
    %327 = vector.shape_cast %326 : vector<8x1xi1> to vector<8x1xi1>
    %328 = vector.broadcast %327 : vector<8x1xi1> to vector<8x32xi1>
    %329 = arith.select %328, %324, %297 : vector<8x32xi1>, vector<8x32xf32>
    %330 = vector.extract_strided_slice %329 {offsets = [0, 0], sizes = [4, 32], strides = [1, 1]} : vector<8x32xf32> to vector<4x32xf32>
    %331 = vector.extract_strided_slice %329 {offsets = [4, 0], sizes = [1, 32], strides = [1, 1]} : vector<8x32xf32> to vector<1x32xf32>
    %c144 = arith.constant 144 : index
    %c0_75 = arith.constant 0 : index
    %332 = vector.load %arg5[%c144, %c0_75] : memref<240x128xf32, #tpu.memory_space<vmem>>, vector<32x128xf32>
    %cst_76 = arith.constant dense<0.000000e+00> : vector<4x128xf32>
    %333 = tpu.matmul %330, %332, %cst_76 {dimension_numbers = #tpu.dot_dimension_numbers<[1], [0], [0], [1], [0, 0, 1, 1], [], []>} : vector<4x32xf32>, vector<32x128xf32>, vector<4x128xf32> -> vector<4x128xf32>
    %c0_77 = arith.constant 0 : index
    %c0_78 = arith.constant 0 : index
    %334 = vector.load %arg2[%c0_77, %c0_78] : memref<4x16xf32, #tpu.memory_space<vmem>>, vector<4x16xf32>
    %c176 = arith.constant 176 : index
    %c0_79 = arith.constant 0 : index
    %335 = vector.load %arg5[%c176, %c0_79] : memref<240x128xf32, #tpu.memory_space<vmem>>, vector<16x128xf32>
    %cst_80 = arith.constant dense<0.000000e+00> : vector<4x128xf32>
    %336 = tpu.matmul %334, %335, %cst_80 {dimension_numbers = #tpu.dot_dimension_numbers<[1], [0], [0], [1], [0, 0, 1, 1], [], []>} : vector<4x16xf32>, vector<16x128xf32>, vector<4x128xf32> -> vector<4x128xf32>
    %337 = arith.addf %333, %336 : vector<4x128xf32>
    %c224 = arith.constant 224 : index
    %c0_81 = arith.constant 0 : index
    %338 = vector.load %arg5[%c224, %c0_81] : memref<240x128xf32, #tpu.memory_space<vmem>>, vector<1x128xf32>
    %339 = vector.broadcast %338 : vector<1x128xf32> to vector<4x128xf32>
    %340 = arith.addf %337, %339 : vector<4x128xf32>
    %c192 = arith.constant 192 : index
    %c0_82 = arith.constant 0 : index
    %341 = vector.load %arg5[%c192, %c0_82] : memref<240x128xf32, #tpu.memory_space<vmem>>, vector<32x128xf32>
    %cst_83 = arith.constant 0.000000e+00 : f32
    %342 = vector.broadcast %cst_83 : f32 to vector<1x32xf32>
    %cst_84 = arith.constant 0.000000e+00 : f32
    %343 = vector.broadcast %cst_84 : f32 to vector<1x32xf32>
    %344 = vector.extract_strided_slice %340 {offsets = [3, 0], sizes = [1, 128], strides = [1, 1]} : vector<4x128xf32> to vector<1x128xf32>
    %cst_85 = arith.constant dense<0.000000e+00> : vector<1x128xf32>
    %345 = tpu.matmul %342, %341, %cst_85 {dimension_numbers = #tpu.dot_dimension_numbers<[1], [0], [0], [1], [0, 0, 1, 1], [], []>} : vector<1x32xf32>, vector<32x128xf32>, vector<1x128xf32> -> vector<1x128xf32>
    %346 = arith.addf %344, %345 : vector<1x128xf32>
    %347 = arith.negf %346 : vector<1x128xf32>
    %348 = math.exp %347 : vector<1x128xf32>
    %cst_86 = arith.constant 1.000000e+00 : f32
    %349 = vector.broadcast %cst_86 : f32 to vector<1x128xf32>
    %350 = arith.addf %349, %348 : vector<1x128xf32>
    %351 = arith.divf %349, %350 : vector<1x128xf32>
    %352 = math.tanh %346 : vector<1x128xf32>
    %353 = vector.extract_strided_slice %351 {offsets = [0, 32], sizes = [1, 32], strides = [1, 1]} : vector<1x128xf32> to vector<1x32xf32>
    %354 = arith.mulf %353, %343 : vector<1x32xf32>
    %355 = vector.extract_strided_slice %351 {offsets = [0, 0], sizes = [1, 32], strides = [1, 1]} : vector<1x128xf32> to vector<1x32xf32>
    %356 = vector.extract_strided_slice %352 {offsets = [0, 64], sizes = [1, 32], strides = [1, 1]} : vector<1x128xf32> to vector<1x32xf32>
    %357 = arith.mulf %355, %356 : vector<1x32xf32>
    %358 = arith.addf %354, %357 : vector<1x32xf32>
    %359 = vector.extract_strided_slice %351 {offsets = [0, 96], sizes = [1, 32], strides = [1, 1]} : vector<1x128xf32> to vector<1x32xf32>
    %360 = math.tanh %358 : vector<1x32xf32>
    %361 = arith.mulf %359, %360 : vector<1x32xf32>
    %362 = vector.extract_strided_slice %340 {offsets = [2, 0], sizes = [1, 128], strides = [1, 1]} : vector<4x128xf32> to vector<1x128xf32>
    %cst_87 = arith.constant dense<0.000000e+00> : vector<1x128xf32>
    %363 = tpu.matmul %361, %341, %cst_87 {dimension_numbers = #tpu.dot_dimension_numbers<[1], [0], [0], [1], [0, 0, 1, 1], [], []>} : vector<1x32xf32>, vector<32x128xf32>, vector<1x128xf32> -> vector<1x128xf32>
    %364 = arith.addf %362, %363 : vector<1x128xf32>
    %365 = arith.negf %364 : vector<1x128xf32>
    %366 = math.exp %365 : vector<1x128xf32>
    %cst_88 = arith.constant 1.000000e+00 : f32
    %367 = vector.broadcast %cst_88 : f32 to vector<1x128xf32>
    %368 = arith.addf %367, %366 : vector<1x128xf32>
    %369 = arith.divf %367, %368 : vector<1x128xf32>
    %370 = math.tanh %364 : vector<1x128xf32>
    %371 = vector.extract_strided_slice %369 {offsets = [0, 32], sizes = [1, 32], strides = [1, 1]} : vector<1x128xf32> to vector<1x32xf32>
    %372 = arith.mulf %371, %358 : vector<1x32xf32>
    %373 = vector.extract_strided_slice %369 {offsets = [0, 0], sizes = [1, 32], strides = [1, 1]} : vector<1x128xf32> to vector<1x32xf32>
    %374 = vector.extract_strided_slice %370 {offsets = [0, 64], sizes = [1, 32], strides = [1, 1]} : vector<1x128xf32> to vector<1x32xf32>
    %375 = arith.mulf %373, %374 : vector<1x32xf32>
    %376 = arith.addf %372, %375 : vector<1x32xf32>
    %377 = vector.extract_strided_slice %369 {offsets = [0, 96], sizes = [1, 32], strides = [1, 1]} : vector<1x128xf32> to vector<1x32xf32>
    %378 = math.tanh %376 : vector<1x32xf32>
    %379 = arith.mulf %377, %378 : vector<1x32xf32>
    %380 = vector.extract_strided_slice %340 {offsets = [1, 0], sizes = [1, 128], strides = [1, 1]} : vector<4x128xf32> to vector<1x128xf32>
    %cst_89 = arith.constant dense<0.000000e+00> : vector<1x128xf32>
    %381 = tpu.matmul %379, %341, %cst_89 {dimension_numbers = #tpu.dot_dimension_numbers<[1], [0], [0], [1], [0, 0, 1, 1], [], []>} : vector<1x32xf32>, vector<32x128xf32>, vector<1x128xf32> -> vector<1x128xf32>
    %382 = arith.addf %380, %381 : vector<1x128xf32>
    %383 = arith.negf %382 : vector<1x128xf32>
    %384 = math.exp %383 : vector<1x128xf32>
    %cst_90 = arith.constant 1.000000e+00 : f32
    %385 = vector.broadcast %cst_90 : f32 to vector<1x128xf32>
    %386 = arith.addf %385, %384 : vector<1x128xf32>
    %387 = arith.divf %385, %386 : vector<1x128xf32>
    %388 = math.tanh %382 : vector<1x128xf32>
    %389 = vector.extract_strided_slice %387 {offsets = [0, 32], sizes = [1, 32], strides = [1, 1]} : vector<1x128xf32> to vector<1x32xf32>
    %390 = arith.mulf %389, %376 : vector<1x32xf32>
    %391 = vector.extract_strided_slice %387 {offsets = [0, 0], sizes = [1, 32], strides = [1, 1]} : vector<1x128xf32> to vector<1x32xf32>
    %392 = vector.extract_strided_slice %388 {offsets = [0, 64], sizes = [1, 32], strides = [1, 1]} : vector<1x128xf32> to vector<1x32xf32>
    %393 = arith.mulf %391, %392 : vector<1x32xf32>
    %394 = arith.addf %390, %393 : vector<1x32xf32>
    %395 = vector.extract_strided_slice %387 {offsets = [0, 96], sizes = [1, 32], strides = [1, 1]} : vector<1x128xf32> to vector<1x32xf32>
    %396 = math.tanh %394 : vector<1x32xf32>
    %397 = arith.mulf %395, %396 : vector<1x32xf32>
    %398 = vector.extract_strided_slice %340 {offsets = [0, 0], sizes = [1, 128], strides = [1, 1]} : vector<4x128xf32> to vector<1x128xf32>
    %cst_91 = arith.constant dense<0.000000e+00> : vector<1x128xf32>
    %399 = tpu.matmul %397, %341, %cst_91 {dimension_numbers = #tpu.dot_dimension_numbers<[1], [0], [0], [1], [0, 0, 1, 1], [], []>} : vector<1x32xf32>, vector<32x128xf32>, vector<1x128xf32> -> vector<1x128xf32>
    %400 = arith.addf %398, %399 : vector<1x128xf32>
    %401 = arith.negf %400 : vector<1x128xf32>
    %402 = math.exp %401 : vector<1x128xf32>
    %cst_92 = arith.constant 1.000000e+00 : f32
    %403 = vector.broadcast %cst_92 : f32 to vector<1x128xf32>
    %404 = arith.addf %403, %402 : vector<1x128xf32>
    %405 = arith.divf %403, %404 : vector<1x128xf32>
    %406 = math.tanh %400 : vector<1x128xf32>
    %407 = vector.extract_strided_slice %405 {offsets = [0, 32], sizes = [1, 32], strides = [1, 1]} : vector<1x128xf32> to vector<1x32xf32>
    %408 = arith.mulf %407, %394 : vector<1x32xf32>
    %409 = vector.extract_strided_slice %405 {offsets = [0, 0], sizes = [1, 32], strides = [1, 1]} : vector<1x128xf32> to vector<1x32xf32>
    %410 = vector.extract_strided_slice %406 {offsets = [0, 64], sizes = [1, 32], strides = [1, 1]} : vector<1x128xf32> to vector<1x32xf32>
    %411 = arith.mulf %409, %410 : vector<1x32xf32>
    %412 = arith.addf %408, %411 : vector<1x32xf32>
    %413 = vector.extract_strided_slice %405 {offsets = [0, 96], sizes = [1, 32], strides = [1, 1]} : vector<1x128xf32> to vector<1x32xf32>
    %414 = math.tanh %412 : vector<1x32xf32>
    %415 = arith.mulf %413, %414 : vector<1x32xf32>
    %c0_93 = arith.constant 0 : index
    %c0_94 = arith.constant 0 : index
    %416 = vector.load %arg4[%c0_93, %c0_94] : memref<1x31xf32, #tpu.memory_space<vmem>>, vector<1x31xf32>
    %cst_95 = arith.constant 1.000000e+00 : f32
    %417 = vector.broadcast %cst_95 : f32 to vector<1x1xf32>
    %418 = tpu.concatenate %415, %416, %331, %417 in 1 : vector<1x32xf32>, vector<1x31xf32>, vector<1x32xf32>, vector<1x1xf32> -> vector<1x96xf32>
    %c232 = arith.constant 232 : index
    %c0_96 = arith.constant 0 : index
    %419 = vector.load %arg5[%c232, %c0_96] : memref<240x128xf32, #tpu.memory_space<vmem>>, vector<1x128xf32>
    %420 = vector.extract_strided_slice %419 {offsets = [0, 0], sizes = [1, 96], strides = [1, 1]} : vector<1x128xf32> to vector<1x96xf32>
    %421 = arith.mulf %418, %420 : vector<1x96xf32>
    %cst_97 = arith.constant dense<0.000000e+00> : vector<1xf32>
    %422 = vector.multi_reduction <add>, %421, %cst_97 [1] : vector<1x96xf32> to vector<1xf32>
    %423 = vector.shape_cast %422 : vector<1xf32> to vector<1x1xf32>
    %424 = arith.negf %423 : vector<1x1xf32>
    %425 = math.exp %424 : vector<1x1xf32>
    %cst_98 = arith.constant 1.000000e+00 : f32
    %426 = vector.broadcast %cst_98 : f32 to vector<1x1xf32>
    %427 = arith.addf %426, %425 : vector<1x1xf32>
    %428 = arith.divf %426, %427 : vector<1x1xf32>
    %c0_99 = arith.constant 0 : index
    %c0_100 = arith.constant 0 : index
    %429 = vector.load %arg6[%c0_99, %c0_100] : memref<1x1xf32, #tpu.memory_space<vmem>>, vector<1x1xf32>
    tpu.vector_store %arg6[%c0_99, %c0_100], %428 {strides = array<i32>} : memref<1x1xf32, #tpu.memory_space<vmem>>, vector<1x1xf32>,
    return
  }
}

</mosaic_0001>

<bundles_post_ra>
// kernel: dm_forward.1
= control target key start
LH: loop header
LB: loop body
LE: loop exit
PB: predicated region body
PF: predicated region fallthrough
CT: control target
= control target key end

     0   :  { %11 = vsyncpa [#allocation4], 0  ;;  %s1850_s0 = inlined_call_operand.hbm [shape: f32[32,32], index: 0, kind: input, shape index: {}]   ;;  %s1851_s1 = inlined_call_operand.vmem [shape: s32[4,1], index: 1, kind: input, shape index: {}]   ;;  %s1852_s2 = inlined_call_operand.vmem [shape: f32[4,16], index: 2, kind: input, shape index: {}]   ;;  %s1853_s3 = inlined_call_operand.hbm [shape: f32[8,32], index: 3, kind: input, shape index: {}]   ;;  %s1854_s4 = inlined_call_operand.vmem [shape: f32[1,31], index: 4, kind: input, shape index: {}]   ;;  %s1855_s5 = inlined_call_operand.hbm [shape: f32[240,128], index: 5, kind: input, shape index: {}]   ;;  %s1856_s6 = inlined_call_operand.hbm [shape: f32[1,1], index: 6, kind: output, shape index: {}]  }
   0x1   :  { %12 = vsyncpa [#allocation7], 0  ;;  %s36_s23 = sshll.u32 %s1853_s3, 4  ;;  %s37_s23 = int_to_ptr.hbm [resolvable:$true] %s36_s23 }
   0x2   :  { %13 = vsyncpa [#allocation5], 0  ;;  %s1520_s24 = smov [#allocation6]   ;;  %s18_s28 = sshll.u32 %s1850_s0, 4  ;;  %s19_s28 = int_to_ptr.hbm [resolvable:$true] %s18_s28 }
   0x3   :  { %s38_s25 = sshll.u32 %s1520_s24, 4  ;;  %s1521_s29 = smov [#allocation3]   ;;  %s39_s25 = int_to_ptr.vmem [resolvable:$true] %s38_s25 }
   0x4   :  { %41 = dma.hbm_to_vmem [thread:$0]  %s37_s23, 128, %s39_s25, [#allocation7]  }
   0x5   :  { %s20_s30 = sshll.u32 %s1521_s29, 4  ;;  %s1522_s7 = smov 128   ;;  %s21_s30 = int_to_ptr.vmem [resolvable:$true] %s20_s30 }
   0x6   :  { %s1523_s8 = smov 8   ;;  %s48_s3 = sshll.u32 %s1855_s5, 4  ;;  %s49_s3 = int_to_ptr.hbm [resolvable:$true] %s48_s3 }
   0x7   :  { %26 = dma.hbm_to_vmem [thread:$0]  %s19_s28, 512, %s21_s30, [#allocation4], %s1522_s7, %s1522_s7, %s1523_s8  }
   0x8   :  { %s1524_s11 = smov [#allocation8]  }
   0x9   :  { %s50_s12 = sshll.u32 %s1524_s11, 4  ;;  %s51_s12 = int_to_ptr.vmem [resolvable:$true] %s50_s12 }
   0xa   :  { %56 = dma.hbm_to_vmem [thread:$0]  %s49_s3, 3840, %s51_s12, [#allocation7], %s1522_s7, %s1522_s7, %s1523_s8  }
   0xb   :  { %1514 = dma.done.wait [#allocation4], 512  }
   0xc   :  { %1515 = vsyncadd [#allocation4], 4294966784 }
   0xd   :  { %1516 = dma.done.wait [#allocation7], 3968  }
   0xe   :  { %1517 = vsyncadd [#allocation7], 4294963328  ;;  %v219_v0 = vlaneseq  ;;  %v76_v2 = vld [vmem:[#allocation8 + $0x18] sm:$0xff]  ;;  %v75_v4 = vld [vmem:[#allocation8 + $0x10] sm:$0xff]  ;;  %vm79_vm2 = vcmask 261120   ;;  %v1525_v16 = vmov 0.0  }
   0xf   :  { %v1575_v3 = vld [vmem:[#allocation8 + $0x58] sm:$0xff]  ;;  %104 = vmatpush.msra.mxu0 %v76_v2  ;;  %v1578_v5 = vld [vmem:[#allocation8 + $0x50] sm:$0xff]  ;;  %v74_v6 = vld [vmem:[#allocation8 + $0x8] sm:$0xff]  ;;  %vm234_vm3 = vcmask 523264   ;;  %vm154_vm4 = vcmask 1043456   ;;  %vm156_vm5 = vcmask 1044480  }
  0x10   :  { %v220_v1 = vshrl.u32 %v219_v0, 7  ;;  %246 = vmatpush.msra.mxu2 %v1575_v3  ;;  %v1580_v7 = vld [vmem:[#allocation8 + $0x48] sm:$0xff]  ;;  %327 = vmatpush.msra.mxu3 %v1575_v3  ;;  %v125_v8 = vld [vmem:[#allocation8 + $0x80] sm:$0xff]  ;;  %v124_v9 = vld [vmem:[#allocation8 + $0x78] sm:$0xff]  ;;  %s1526_s0 = smov 64   ;;  %s1527_s5 = smov 32  }
  0x11   :  { %105 = vmatpush.msra.mxu0 %v75_v4  ;;  %v73_v10 = vld [vmem:[#allocation8] sm:$0xff]  ;;  %143 = vmatpush.msra.mxu1 %v125_v8  ;;  %v69_v12 = vld [vmem:[#allocation3] sm:$0xff]  ;;  %v123_v13 = vld [vmem:[#allocation8 + $0x70] sm:$0xff]  ;;  %s1257_s21 = sshll.u32 %s1856_s6, 4  ;;  %s1258_s21 = int_to_ptr.hbm [resolvable:$true] %s1257_s21 }
  0x12   :  { %247 = vmatpush.msra.mxu2 %v1578_v5  ;;  %vm221_vm0 = vcmp.lt.s32.totalorder %v220_v1, 4  ;;  %vm224_vm1 = vcmp.eq.s32.totalorder %v220_v1, 4  ;;  %v1584_v11 = vld [vmem:[#allocation8 + $0x40] sm:$0xff]  ;;  %328 = vmatpush.msra.mxu3 %v1578_v5  ;;  %v1588_v14 = vld [vmem:[#allocation8 + $0x38] sm:$0xff]  ;;  %v1590_v15 = vld [vmem:[#allocation8 + $0x30] sm:$0xff] }
  0x13   :  { %106 = vmatpush.msra.mxu0 %v74_v6  ;;  %144 = vmatpush.msra.mxu1 %v124_v9  ;;  %v1593_v17 = vsel %vm221_vm0, 1.0, %v1525_v16  ;;  %v1596_v18 = vsel %vm224_vm1, 1.0, %v1525_v16  ;;  %v122_v19 = vld [vmem:[#allocation8 + $0x68] sm:$0xff]  ;;  %v121_v20 = vld [vmem:[#allocation6] sm:$0xff]  ;;  %v211_v24 = vld [vmem:[#allocation8 + $0x20] sm:$0xff] }
  0x14   :  { %248 = vmatpush.msra.mxu2 %v1580_v7  ;;  %329 = vmatpush.msra.mxu3 %v1580_v7  ;;  %v231_v21 = vmul.f32 0.0, %v1593_v17  ;;  %v232_v22 = vmul.f32 0.0, %v1596_v18  ;;  %v1605_v23 = vld [vmem:[#allocation8 + $0x28] sm:$0xff]  ;;  %v70_v25 = vld [vmem:[#allocation3 + $0x8] sm:$0xff]  ;;  %v72_v28 = vld [vmem:[#allocation3 + $0x18] sm:$0xff] }
  0x15   :  { %107 = vmatpush.msra.mxu0 %v73_v10  ;;  %145 = vmatpush.msra.mxu1 %v123_v13  ;;  %v71_v27 = vld [vmem:[#allocation3 + $0x10] sm:$0xff]  ;;  %v1314_v29 = vld [vmem:[#allocation8 + $0x60] ss:$0 sm:$0xff] }
  0x16   :  { %249 = vmatpush.msra.mxu2 %v1584_v11  ;;  %1268 = vmatmul.msk.f32.vlgmr.msra.gmra.mxu0 %vm79_vm2, %v69_v12  ;;  %v233_v26 = vsel %vm79_vm2, %v231_v21, %v232_v22  ;;  %v1315_v31 = vld [vmem:[#allocation8 + $0x88] ss:$0 sm:$0xff]  ;;  %v227_v22 = vld [vmem:[%s1851_s1] sm:$0xf] }
  0x17   :  { %330 = vmatpush.msra.mxu3 %v1584_v11  ;;  %146 = vmatpush.msra.mxu1 %v122_v19 }
  0x18   :  { %250 = vmatpush.msra.mxu2 %v1588_v14  ;;  %651 = vmatpush.msrb.mxu0 %v1575_v3 }
  0x19   :  { %1272 = vmatmul.msk.f32.vlgmr.msra.gmra.mxu1 %vm79_vm2, %v121_v20  ;;  %331 = vmatpush.msra.mxu3 %v1588_v14 }
  0x1a   :  { %251 = vmatpush.msra.mxu2 %v1590_v15  ;;  %408 = vmatpush.msrb.mxu1 %v1575_v3 }
  0x1b   :  { %652 = vmatpush.msrb.mxu0 %v1578_v5  ;;  %332 = vmatpush.msra.mxu3 %v1590_v15 }
  0x1c   :  { %252 = vmatpush.msra.mxu2 %v1605_v23  ;;  %409 = vmatpush.msrb.mxu1 %v1578_v5 }
  0x1d   :  { %653 = vmatpush.msrb.mxu0 %v1580_v7  ;;  %333 = vmatpush.msra.mxu3 %v1605_v23 }
  0x1e   :  { %253 = vmatpush.msra.mxu2 %v211_v24  ;;  %1269 = vmatmul.msk.f32.gmra.mxu0 %vm79_vm2, %v70_v25 }
  0x1f   :  { %1275 = vmatmul.msk.f32.vlgmr.msra.gmra.mxu2 %vm234_vm3, %v233_v26  ;;  %410 = vmatpush.msrb.mxu1 %v1580_v7 }
  0x20   :  { %489 = vmatpush.msrb.mxu2 %v1575_v3  ;;  %654 = vmatpush.msrb.mxu0 %v1584_v11 }
  0x21   :  { %334 = vmatpush.msra.mxu3 %v211_v24  ;;  %411 = vmatpush.msrb.mxu1 %v1584_v11 }
  0x22   :  { %490 = vmatpush.msrb.mxu2 %v1578_v5  ;;  %655 = vmatpush.msrb.mxu0 %v1588_v14 }
  0x23   :  { %570 = vmatpush.msrb.mxu3 %v1575_v3  ;;  %412 = vmatpush.msrb.mxu1 %v1588_v14 }
  0x24   :  { %491 = vmatpush.msrb.mxu2 %v1580_v7  ;;  %656 = vmatpush.msrb.mxu0 %v1590_v15 }
  0x25   :  { %571 = vmatpush.msrb.mxu3 %v1578_v5  ;;  %413 = vmatpush.msrb.mxu1 %v1590_v15 }
  0x26   :  { %1270 = vmatmul.msk.f32.gmra.mxu0 %vm79_vm2, %v71_v27  ;;  %492 = vmatpush.msrb.mxu2 %v1584_v11 }
  0x27   :  { %414 = vmatpush.msrb.mxu1 %v1605_v23  ;;  %572 = vmatpush.msrb.mxu3 %v1580_v7 }
  0x28   :  { %493 = vmatpush.msrb.mxu2 %v1588_v14  ;;  %657 = vmatpush.msrb.mxu0 %v1605_v23 }
  0x29   :  { %415 = vmatpush.msrb.mxu1 %v211_v24  ;;  %573 = vmatpush.msrb.mxu3 %v1584_v11 }
  0x2a   :  { %494 = vmatpush.msrb.mxu2 %v1590_v15  ;;  %658 = vmatpush.msrb.mxu0 %v211_v24 }
  0x2b   :  { %574 = vmatpush.msrb.mxu3 %v1588_v14  ;;  %732 = vmatpush.msra.mxu1 %v1575_v3 }
  0x2c   :  { %495 = vmatpush.msrb.mxu2 %v1605_v23 }
  0x2d   :  { %575 = vmatpush.msrb.mxu3 %v1590_v15  ;;  %733 = vmatpush.msra.mxu1 %v1578_v5 }
  0x2e   :  { %1271 = vmatmul.msk.f32.gmra.mxu0 %vm79_vm2, %v72_v28  ;;  %496 = vmatpush.msrb.mxu2 %v211_v24 }
  0x2f   :  { %576 = vmatpush.msrb.mxu3 %v1605_v23  ;;  %734 = vmatpush.msra.mxu1 %v1580_v7 }
  0x30   :  { %813 = vmatpush.msra.mxu2 %v1575_v3 }
  0x31   :  { %577 = vmatpush.msrb.mxu3 %v211_v24  ;;  %735 = vmatpush.msra.mxu1 %v1584_v11 }
  0x32   :  { %814 = vmatpush.msra.mxu2 %v1578_v5 }
  0x33   :  { %736 = vmatpush.msra.mxu1 %v1588_v14 }
  0x34   :  { %815 = vmatpush.msra.mxu2 %v1580_v7 }
  0x35   :  { %737 = vmatpush.msra.mxu1 %v1590_v15 }
  0x36   :  { %816 = vmatpush.msra.mxu2 %v1584_v11 }
  0x37   :  { %738 = vmatpush.msra.mxu1 %v1605_v23 }
  0x38   :  { %817 = vmatpush.msra.mxu2 %v1588_v14 }
  0x39   :  { %739 = vmatpush.msra.mxu1 %v211_v24 }
  0x3a   :  { %818 = vmatpush.msra.mxu2 %v1590_v15  ;;  %v1528_v15 = vmov 0  }
  0x3b   :  { %1312 = vset.pattern.permute.xlu1 %v1528_v15  ;;  %1313 = vset.pattern.permute.xlu0 %v1528_v15 }
  0x3c   :  { %819 = vmatpush.msra.mxu2 %v1605_v23  ;;  %v228_v23 = vsel %vm154_vm4, %v227_v22, 8 }
  0x3d   :  { %v1692_v25 = vsel %vm156_vm5, %v228_v23, 0 }
  0x3e   :  { %820 = vmatpush.msra.mxu2 %v211_v24  ;;  %vm296_vm10 = vcmp.gt.s32.totalorder %v1692_v25, 0  ;;  %vm377_vm12 = vcmp.gt.s32.totalorder %v1692_v25, 1 }
  0x3f   :  { %v297_v26 = vsel %vm296_vm10, 1, %v1528_v15 }
  0x93   :  { %v109_v30 = vpop.f32.mrf.mxu0 }
  0x94   :  { %v110_v32 = vadd.f32 %v1314_v29, %v109_v30 }
  0x96   :  { %v148_v33 = vpop.f32.mrf.mxu1  ;;  %v160_v34 = vrot.slane %v110_v32, 4 }
  0x97   :  { %v149_v35 = vadd.f32 %v1315_v31, %v148_v33 }
  0x99   :  { %v152_v36 = vrot.slane %v149_v35, 4  ;;  %v162_v37 = vrot.slane %v149_v35, 5  ;;  %v168_v38 = vrot.slane %v149_v35, 6  ;;  %v177_v43 = vrot.slane %v149_v35, 7 }
  0x9a   :  { %v190_v54 = vrot.slane %v149_v35, 1  ;;  %v196_v59 = vrot.slane %v149_v35, 2  ;;  %v205_v62 = vrot.slane %v149_v35, 3 }
  0x9b   :  { %v112_v39 = vpop.f32.mrf.mxu0  ;;  %v1661_v40 = vsel %vm154_vm4, %v160_v34, %v162_v37  ;;  %v155_v42 = vsel %vm154_vm4, %v110_v32, %v152_v36 }
  0x9c   :  { %v113_v41 = vadd.f32 %v1314_v29, %v112_v39  ;;  %v157_v46 = vsel %vm156_vm5, %v155_v42, 0.0  ;;  %v165_v36 = vsel %vm156_vm5, %v1661_v40, 0.0 }
  0x9e   :  { %v175_v44 = vrot.slane %v113_v41, 4  ;;  %v1665_v45 = vsel %vm154_vm4, %v113_v41, %v168_v38 }
  0xa0   :  { %v1669_v47 = vsel %vm154_vm4, %v175_v44, %v177_v43  ;;  %v378_v44 = vsel %vm377_vm12, 1, %v1528_v15 }
  0xa2   :  { %v255_v48 = vpop.f32.mrf.mxu2 }
  0xa3   :  { %v258_v49 = vadd.f32 %v255_v48, %v157_v46  ;;  %v115_v50 = vpop.f32.mrf.mxu0 }
  0xa4   :  { %v116_v51 = vadd.f32 %v1314_v29, %v115_v50 }
  0xa5   :  { %1318 = vtanh.f32 %v258_v49  ;;  %v1276_v0 = vmul.f32 -1.442695, %v258_v49 }
  0xa6   :  { %v188_v52 = vrot.slane %v116_v51, 4  ;;  %v1672_v53 = vsel %vm154_vm4, %v116_v51, %v149_v35 }
  0xa7   :  { %1320 = vpow2.f32 %v1276_v0 }
  0xa8   :  { %v1675_v55 = vsel %vm154_vm4, %v188_v52, %v190_v54 }
  0xab   :  { %v1319_v56 = vpop.eup %1318  ;;  %v118_v57 = vpop.f32.mrf.mxu0 }
  0xac   :  { %281 = vrot.lane.b32.xlu0 %v1319_v56, %s1526_s0  ;;  %v119_v58 = vadd.f32 %v1314_v29, %v118_v57 }
  0xad   :  { %v1321_v1 = vpop.eup %1320 }
  0xae   :  { %v203_v60 = vrot.slane %v119_v58, 4  ;;  %v1679_v61 = vsel %vm154_vm4, %v119_v58, %v196_v59  ;;  %v262_v2 = vadd.f32 1.0, %v1321_v1 }
  0xb0   :  { %v1682_v63 = vsel %vm154_vm4, %v203_v60, %v205_v62  ;;  %1322 = vrcp.f32 %v262_v2  ;;  %v274_v8 = vand.u32 2147483648, %v262_v2  ;;  %vm268_vm7 = vweird.f32 %v262_v2 }
  0xb1   :  { %v272_v9 = vand.u32 2147483647, %v262_v2  ;;  %vm458_vm4 = vcmp.gt.s32.totalorder %v1692_v25, 2 }
  0xb2   :  { %v275_v11 = vor.u32 1.1754944e-38, %v274_v8 }
  0xb3   :  { %vm273_vm9 = vcmp.eq.f32.partialorder %v272_v9, 8.507059e+37 }
  0xb6   :  { %v1323_v3 = vpop.eup %1322 }
  0xb7   :  { %v264_v4 = vmul.f32 %v1323_v3, %v262_v2  ;;  %vm269_vm6 = vweird.f32 %v1323_v3 }
  0xb8   :  { %vm270_vm8 = vmor %vm268_vm7, %vm269_vm6 }
  0xb9   :  { %v265_v5 = vsub.f32 1.0, %v264_v4 }
  0xbb   :  { %v266_v6 = vmul.f32 %v1323_v3, %v265_v5 }
  0xbd   :  { %v267_v7 = vadd.f32 %v1323_v3, %v266_v6 }
  0xbf   :  { %v271_v10 = vsel %vm270_vm8, %v1323_v3, %v267_v7 }
  0xc0   :  { %v276_v13 = vsel %vm273_vm9, %v275_v11, %v271_v10 }
  0xc1   :  { %v279_v19 = vmul.f32 0.0, %v276_v13 }
 0x11e   :  { %v282_v12 = vpop.permute.xlu0 %281 }
 0x11f   :  { %v284_v14 = vmul.f32 %v282_v12, %v276_v13  ;;  %v171_v12 = vsel %vm156_vm5, %v1665_v45, 0.0 }
 0x121   :  { %286 = vrot.lane.b32.xlu0 %v284_v14, %s1527_s5 }
 0x193   :  { %v287_v20 = vpop.permute.xlu0 %286 }
 0x194   :  { %v289_v21 = vadd.f32 %v287_v20, %v279_v19  ;;  %v459_v20 = vsel %vm458_vm4, 1, %v1528_v15 }
 0x196   :  { %1324 = vtanh.f32 %v289_v21 }
 0x19c   :  { %v1325_v24 = vpop.eup %1324 }
 0x19d   :  { %292 = vrot.lane.b32.xlu1 %v1325_v24, %s1526_s0 }
 0x1a5   :  { %299 = vperm.xlu1 %1312, %v297_v26  }
 0x20f   :  { %v293_v27 = vpop.permute.xlu1 %292 }
 0x210   :  { %v295_v28 = vmul.f32 %v293_v27, %v276_v13 }
 0x217   :  { %v300_v29 = vpop.permute.xlu1 %299 }
 0x218   :  { %vm301_vm11 = vcmp.eq.s32.totalorder %v300_v29, 1 }
 0x219   :  { %v302_v30 = vsel %vm301_vm11, %v295_v28, 0.0  ;;  %v303_v60 = vsel %vm301_vm11, %v289_v21, 0.0  ;;  %vm539_vm11 = vcmp.gt.s32.totalorder %v1692_v25, 3 }
 0x21a   :  { %v305_v31 = vmul.f32 %v1593_v17, %v302_v30  ;;  %v306_v32 = vmul.f32 %v1596_v18, %v302_v30 }
 0x21c   :  { %308 = vrot.lane.b32.xlu2 %v305_v31, %s1527_s5 }
 0x224   :  { %312 = vrot.lane.b32.xlu2 %v306_v32, %s1526_s0 }
 0x276   :  { %v309_v33 = vpop.permute.xlu2 %308 }
 0x27e   :  { %v313_v34 = vpop.permute.xlu2 %312 }
 0x27f   :  { %v315_v35 = vsel %vm79_vm2, %v309_v33, %v313_v34 }
 0x280   :  { %1277 = vmatmul.msk.f32.vlgmr.msra.gmra.mxu3 %vm234_vm3, %v315_v35 }
 0x303   :  { %v336_v37 = vpop.f32.mrf.mxu3 }
 0x304   :  { %v339_v38 = vadd.f32 %v336_v37, %v165_v36 }
 0x306   :  { %1326 = vtanh.f32 %v339_v38  ;;  %v1278_v41 = vmul.f32 -1.442695, %v339_v38 }
 0x308   :  { %1328 = vpow2.f32 %v1278_v41 }
 0x30c   :  { %v1327_v39 = vpop.eup %1326 }
 0x30d   :  { %362 = vrot.lane.b32.xlu0 %v1327_v39, %s1526_s0 }
 0x30e   :  { %v1329_v42 = vpop.eup %1328 }
 0x30f   :  { %v343_v43 = vadd.f32 1.0, %v1329_v42 }
 0x311   :  { %1330 = vrcp.f32 %v343_v43  ;;  %v355_v51 = vand.u32 2147483648, %v343_v43  ;;  %vm349_vm14 = vweird.f32 %v343_v43  ;;  %v353_v52 = vand.u32 2147483647, %v343_v43 }
 0x313   :  { %v356_v56 = vor.u32 1.1754944e-38, %v355_v51  ;;  %vm354_vm0 = vcmp.eq.f32.partialorder %v353_v52, 8.507059e+37  ;;  %v180_v52 = vsel %vm156_vm5, %v1669_v47, 0.0 }
 0x315   :  { %380 = vperm.xlu0 %1313, %v378_v44  }
 0x317   :  { %v1331_v46 = vpop.eup %1330 }
 0x318   :  { %v345_v48 = vmul.f32 %v1331_v46, %v343_v43  ;;  %vm350_vm13 = vweird.f32 %v1331_v46 }
 0x319   :  { %vm351_vm15 = vmor %vm349_vm14, %vm350_vm13 }
 0x31a   :  { %v346_v49 = vsub.f32 1.0, %v345_v48 }
 0x31c   :  { %v347_v40 = vmul.f32 %v1331_v46, %v346_v49 }
 0x31e   :  { %v348_v50 = vadd.f32 %v1331_v46, %v347_v40 }
 0x320   :  { %v352_v54 = vsel %vm351_vm15, %v1331_v46, %v348_v50 }
 0x321   :  { %v357_v58 = vsel %vm354_vm0, %v356_v56, %v352_v54 }
 0x322   :  { %v360_v62 = vmul.f32 %v357_v58, %v303_v60 }
 0x37f   :  { %v363_v57 = vpop.permute.xlu0 %362 }
 0x380   :  { %v365_v59 = vmul.f32 %v363_v57, %v357_v58 }
 0x382   :  { %367 = vrot.lane.b32.xlu1 %v365_v59, %s1527_s5 }
 0x387   :  { %v381_v3 = vpop.permute.xlu0 %380 }
 0x388   :  { %vm382_vm1 = vcmp.eq.s32.totalorder %v381_v3, 1 }
 0x3f4   :  { %v368_v0 = vpop.permute.xlu1 %367 }
 0x3f5   :  { %v370_v1 = vadd.f32 %v368_v0, %v360_v62 }
 0x3f7   :  { %1332 = vtanh.f32 %v370_v1  ;;  %v384_v36 = vsel %vm382_vm1, %v370_v1, %v303_v60 }
 0x3fd   :  { %v1333_v2 = vpop.eup %1332 }
 0x3fe   :  { %373 = vrot.lane.b32.xlu2 %v1333_v2, %s1526_s0 }
 0x458   :  { %v374_v4 = vpop.permute.xlu2 %373 }
 0x459   :  { %v376_v5 = vmul.f32 %v374_v4, %v357_v58  ;;  %v540_v58 = vsel %vm539_vm11, 1, %v1528_v15 }
 0x45b   :  { %v383_v6 = vsel %vm382_vm1, %v376_v5, %v302_v30  ;;  %vm620_vm1 = vcmp.gt.s32.totalorder %v1692_v25, 4 }
 0x45c   :  { %v387_v7 = vmul.f32 %v1596_v18, %v383_v6  ;;  %v386_v8 = vmul.f32 %v1593_v17, %v383_v6 }
 0x45e   :  { %393 = vrot.lane.b32.xlu2 %v387_v7, %s1526_s0  ;;  %389 = vrot.lane.b32.xlu1 %v386_v8, %s1527_s5 }
 0x4b8   :  { %v394_v9 = vpop.permute.xlu2 %393 }
 0x4d0   :  { %v390_v10 = vpop.permute.xlu1 %389 }
 0x4d1   :  { %v396_v11 = vsel %vm79_vm2, %v390_v10, %v394_v9 }
 0x4d2   :  { %1279 = vmatmul.msk.f32.vlgmr.msrb.gmra.mxu1 %vm234_vm3, %v396_v11 }
 0x54f   :  { %v417_v13 = vpop.f32.mrf.mxu1 }
 0x550   :  { %v420_v14 = vadd.f32 %v417_v13, %v171_v12 }
 0x552   :  { %1334 = vtanh.f32 %v420_v14  ;;  %v1280_v21 = vmul.f32 -1.442695, %v420_v14 }
 0x554   :  { %1336 = vpow2.f32 %v1280_v21 }
 0x558   :  { %v1335_v19 = vpop.eup %1334 }
 0x559   :  { %443 = vrot.lane.b32.xlu1 %v1335_v19, %s1526_s0 }
 0x55a   :  { %v1337_v22 = vpop.eup %1336 }
 0x55b   :  { %v424_v23 = vadd.f32 1.0, %v1337_v22 }
 0x55d   :  { %1338 = vrcp.f32 %v424_v23  ;;  %v436_v29 = vand.u32 2147483648, %v424_v23  ;;  %vm430_vm7 = vweird.f32 %v424_v23  ;;  %v434_v30 = vand.u32 2147483647, %v424_v23 }
 0x55f   :  { %v437_v32 = vor.u32 1.1754944e-38, %v436_v29  ;;  %vm435_vm9 = vcmp.eq.f32.partialorder %v434_v30, 8.507059e+37  ;;  %v184_v29 = vsel %vm156_vm5, %v1672_v53, 0.0 }
 0x561   :  { %461 = vperm.xlu1 %1312, %v459_v20  }
 0x563   :  { %v1339_v24 = vpop.eup %1338 }
 0x564   :  { %v426_v26 = vmul.f32 %v1339_v24, %v424_v23  ;;  %vm431_vm6 = vweird.f32 %v1339_v24 }
 0x565   :  { %vm432_vm8 = vmor %vm430_vm7, %vm431_vm6 }
 0x566   :  { %v427_v27 = vsub.f32 1.0, %v426_v26 }
 0x568   :  { %v428_v45 = vmul.f32 %v1339_v24, %v427_v27 }
 0x56a   :  { %v429_v28 = vadd.f32 %v1339_v24, %v428_v45 }
 0x56c   :  { %v433_v31 = vsel %vm432_vm8, %v1339_v24, %v429_v28 }
 0x56d   :  { %v438_v34 = vsel %vm435_vm9, %v437_v32, %v433_v31 }
 0x56e   :  { %v441_v37 = vmul.f32 %v438_v34, %v384_v36 }
 0x5cb   :  { %v444_v33 = vpop.permute.xlu1 %443 }
 0x5cc   :  { %v446_v35 = vmul.f32 %v444_v33, %v438_v34  ;;  %v621_v33 = vsel %vm620_vm1, 1, %v1528_v15 }
 0x5ce   :  { %448 = vrot.lane.b32.xlu2 %v446_v35, %s1527_s5 }
 0x5d3   :  { %v462_v42 = vpop.permute.xlu1 %461 }
 0x5d4   :  { %vm463_vm10 = vcmp.eq.s32.totalorder %v462_v42, 1 }
 0x628   :  { %v449_v38 = vpop.permute.xlu2 %448 }
 0x629   :  { %v451_v39 = vadd.f32 %v449_v38, %v441_v37 }
 0x62b   :  { %1340 = vtanh.f32 %v451_v39  ;;  %v465_v11 = vsel %vm463_vm10, %v451_v39, %v384_v36 }
 0x631   :  { %v1341_v41 = vpop.eup %1340 }
 0x632   :  { %454 = vrot.lane.b32.xlu0 %v1341_v41, %s1526_s0 }
 0x6a4   :  { %v455_v43 = vpop.permute.xlu0 %454 }
 0x6a5   :  { %v457_v44 = vmul.f32 %v455_v43, %v438_v34 }
 0x6a7   :  { %v464_v46 = vsel %vm463_vm10, %v457_v44, %v383_v6  ;;  %vm701_vm10 = vcmp.gt.s32.totalorder %v1692_v25, 5 }
 0x6a8   :  { %v468_v48 = vmul.f32 %v1596_v18, %v464_v46  ;;  %v467_v49 = vmul.f32 %v1593_v17, %v464_v46 }
 0x6aa   :  { %474 = vrot.lane.b32.xlu0 %v468_v48, %s1526_s0  ;;  %470 = vrot.lane.b32.xlu2 %v467_v49, %s1527_s5 }
 0x704   :  { %v471_v40 = vpop.permute.xlu2 %470 }
 0x71c   :  { %v475_v50 = vpop.permute.xlu0 %474 }
 0x71d   :  { %v477_v51 = vsel %vm79_vm2, %v471_v40, %v475_v50 }
 0x71e   :  { %1281 = vmatmul.msk.f32.vlgmr.msrb.gmra.mxu2 %vm234_vm3, %v477_v51 }
 0x7a1   :  { %v498_v54 = vpop.f32.mrf.mxu2 }
 0x7a2   :  { %v501_v56 = vadd.f32 %v498_v54, %v180_v52 }
 0x7a4   :  { %1342 = vtanh.f32 %v501_v56  ;;  %v1282_v59 = vmul.f32 -1.442695, %v501_v56 }
 0x7a6   :  { %1344 = vpow2.f32 %v1282_v59 }
 0x7aa   :  { %v1343_v57 = vpop.eup %1342 }
 0x7ab   :  { %524 = vrot.lane.b32.xlu1 %v1343_v57, %s1526_s0 }
 0x7ac   :  { %v1345_v60 = vpop.eup %1344 }
 0x7ad   :  { %v505_v62 = vadd.f32 1.0, %v1345_v60 }
 0x7af   :  { %1346 = vrcp.f32 %v505_v62  ;;  %v517_v4 = vand.u32 2147483648, %v505_v62  ;;  %vm511_vm13 = vweird.f32 %v505_v62  ;;  %v515_v5 = vand.u32 2147483647, %v505_v62 }
 0x7b1   :  { %v518_v7 = vor.u32 1.1754944e-38, %v517_v4  ;;  %vm516_vm15 = vcmp.eq.f32.partialorder %v515_v5, 8.507059e+37 }
 0x7b3   :  { %542 = vperm.xlu1 %1312, %v540_v58  }
 0x7b5   :  { %v1347_v0 = vpop.eup %1346 }
 0x7b6   :  { %v507_v1 = vmul.f32 %v1347_v0, %v505_v62  ;;  %vm512_vm12 = vweird.f32 %v1347_v0 }
 0x7b7   :  { %vm513_vm14 = vmor %vm511_vm13, %vm512_vm12 }
 0x7b8   :  { %v508_v2 = vsub.f32 1.0, %v507_v1 }
 0x7ba   :  { %v509_v47 = vmul.f32 %v1347_v0, %v508_v2 }
 0x7bc   :  { %v510_v3 = vadd.f32 %v1347_v0, %v509_v47 }
 0x7be   :  { %v514_v6 = vsel %vm513_vm14, %v1347_v0, %v510_v3  ;;  %v193_v3 = vsel %vm156_vm5, %v1675_v55, 0.0 }
 0x7bf   :  { %v519_v9 = vsel %vm516_vm15, %v518_v7, %v514_v6  ;;  %v702_v7 = vsel %vm701_vm10, 1, %v1528_v15 }
 0x7c0   :  { %v522_v12 = vmul.f32 %v519_v9, %v465_v11 }
 0x81d   :  { %v525_v8 = vpop.permute.xlu1 %524 }
 0x81e   :  { %v527_v10 = vmul.f32 %v525_v8, %v519_v9 }
 0x820   :  { %529 = vrot.lane.b32.xlu2 %v527_v10, %s1527_s5 }
 0x825   :  { %v543_v20 = vpop.permute.xlu1 %542 }
 0x826   :  { %vm544_vm0 = vcmp.eq.s32.totalorder %v543_v20, 1 }
 0x87a   :  { %v530_v13 = vpop.permute.xlu2 %529 }
 0x87b   :  { %v532_v14 = vadd.f32 %v530_v13, %v522_v12 }
 0x87d   :  { %1348 = vtanh.f32 %v532_v14  ;;  %v546_v50 = vsel %vm544_vm0, %v532_v14, %v465_v11 }
 0x883   :  { %v1349_v19 = vpop.eup %1348 }
 0x884   :  { %535 = vrot.lane.b32.xlu0 %v1349_v19, %s1526_s0 }
 0x8f6   :  { %v536_v21 = vpop.permute.xlu0 %535 }
 0x8f7   :  { %v538_v22 = vmul.f32 %v536_v21, %v519_v9 }
 0x8f9   :  { %v545_v23 = vsel %vm544_vm0, %v538_v22, %v464_v46  ;;  %vm782_vm0 = vcmp.gt.s32.totalorder %v1692_v25, 6 }
 0x8fa   :  { %v549_v24 = vmul.f32 %v1596_v18, %v545_v23  ;;  %v548_v26 = vmul.f32 %v1593_v17, %v545_v23 }
 0x8fc   :  { %555 = vrot.lane.b32.xlu0 %v549_v24, %s1526_s0  ;;  %551 = vrot.lane.b32.xlu2 %v548_v26, %s1527_s5 }
 0x956   :  { %v552_v27 = vpop.permute.xlu2 %551 }
 0x96e   :  { %v556_v45 = vpop.permute.xlu0 %555 }
 0x96f   :  { %v558_v28 = vsel %vm79_vm2, %v552_v27, %v556_v45 }
 0x970   :  { %1283 = vmatmul.msk.f32.vlgmr.msrb.gmra.mxu3 %vm234_vm3, %v558_v28 }
 0x9f3   :  { %v579_v30 = vpop.f32.mrf.mxu3 }
 0x9f4   :  { %v582_v31 = vadd.f32 %v579_v30, %v184_v29 }
 0x9f6   :  { %1350 = vtanh.f32 %v582_v31  ;;  %v1284_v34 = vmul.f32 -1.442695, %v582_v31 }
 0x9f8   :  { %1352 = vpow2.f32 %v1284_v34 }
 0x9fc   :  { %v1351_v32 = vpop.eup %1350 }
 0x9fd   :  { %605 = vrot.lane.b32.xlu1 %v1351_v32, %s1526_s0 }
 0x9fe   :  { %v1353_v35 = vpop.eup %1352 }
 0x9ff   :  { %v586_v36 = vadd.f32 1.0, %v1353_v35 }
 0xa01   :  { %1354 = vrcp.f32 %v586_v36  ;;  %v598_v42 = vand.u32 2147483648, %v586_v36  ;;  %vm592_vm6 = vweird.f32 %v586_v36  ;;  %v596_v43 = vand.u32 2147483647, %v586_v36 }
 0xa03   :  { %v599_v46 = vor.u32 1.1754944e-38, %v598_v42  ;;  %vm597_vm8 = vcmp.eq.f32.partialorder %v596_v43, 8.507059e+37 }
 0xa05   :  { %623 = vperm.xlu1 %1312, %v621_v33  }
 0xa07   :  { %v1355_v37 = vpop.eup %1354 }
 0xa08   :  { %v588_v38 = vmul.f32 %v1355_v37, %v586_v36  ;;  %vm593_vm4 = vweird.f32 %v1355_v37 }
 0xa09   :  { %vm594_vm7 = vmor %vm592_vm6, %vm593_vm4 }
 0xa0a   :  { %v589_v39 = vsub.f32 1.0, %v588_v38 }
 0xa0c   :  { %v590_v53 = vmul.f32 %v1355_v37, %v589_v39 }
 0xa0e   :  { %v591_v41 = vadd.f32 %v1355_v37, %v590_v53  ;;  %v199_v53 = vsel %vm156_vm5, %v1679_v61, 0.0 }
 0xa10   :  { %v595_v44 = vsel %vm594_vm7, %v1355_v37, %v591_v41 }
 0xa11   :  { %v600_v49 = vsel %vm597_vm8, %v599_v46, %v595_v44  ;;  %v783_v44 = vsel %vm782_vm0, 1, %v1528_v15 }
 0xa12   :  { %v603_v51 = vmul.f32 %v600_v49, %v546_v50 }
 0xa6f   :  { %v606_v48 = vpop.permute.xlu1 %605 }
 0xa70   :  { %v608_v40 = vmul.f32 %v606_v48, %v600_v49 }
 0xa72   :  { %610 = vrot.lane.b32.xlu2 %v608_v40, %s1527_s5 }
 0xa77   :  { %v624_v57 = vpop.permute.xlu1 %623 }
 0xa78   :  { %vm625_vm9 = vcmp.eq.s32.totalorder %v624_v57, 1 }
 0xacc   :  { %v611_v52 = vpop.permute.xlu2 %610 }
 0xacd   :  { %v613_v54 = vadd.f32 %v611_v52, %v603_v51 }
 0xacf   :  { %1356 = vtanh.f32 %v613_v54  ;;  %v627_v27 = vsel %vm625_vm9, %v613_v54, %v546_v50 }
 0xad5   :  { %v1357_v56 = vpop.eup %1356 }
 0xad6   :  { %616 = vrot.lane.b32.xlu0 %v1357_v56, %s1526_s0 }
 0xb48   :  { %v617_v58 = vpop.permute.xlu0 %616 }
 0xb49   :  { %v619_v59 = vmul.f32 %v617_v58, %v600_v49 }
 0xb4b   :  { %v626_v60 = vsel %vm625_vm9, %v619_v59, %v545_v23  ;;  %vm863_vm9 = vcmp.gt.s32.totalorder %v1692_v25, 7 }
 0xb4c   :  { %v630_v62 = vmul.f32 %v1596_v18, %v626_v60  ;;  %v629_v0 = vmul.f32 %v1593_v17, %v626_v60 }
 0xb4e   :  { %636 = vrot.lane.b32.xlu0 %v630_v62, %s1526_s0  ;;  %632 = vrot.lane.b32.xlu2 %v629_v0, %s1527_s5 }
 0xba8   :  { %v633_v1 = vpop.permute.xlu2 %632 }
 0xbc0   :  { %v637_v2 = vpop.permute.xlu0 %636 }
 0xbc1   :  { %v639_v47 = vsel %vm79_vm2, %v633_v1, %v637_v2 }
 0xbc2   :  { %1285 = vmatmul.msk.f32.vlgmr.msrb.gmra.mxu0 %vm234_vm3, %v639_v47 }
 0xc3f   :  { %v660_v4 = vpop.f32.mrf.mxu0 }
 0xc40   :  { %v663_v5 = vadd.f32 %v660_v4, %v193_v3 }
 0xc42   :  { %1358 = vtanh.f32 %v663_v5  ;;  %v1286_v8 = vmul.f32 -1.442695, %v663_v5 }
 0xc44   :  { %1360 = vpow2.f32 %v1286_v8 }
 0xc48   :  { %v1359_v6 = vpop.eup %1358 }
 0xc49   :  { %686 = vrot.lane.b32.xlu1 %v1359_v6, %s1526_s0 }
 0xc4a   :  { %v1361_v9 = vpop.eup %1360 }
 0xc4b   :  { %v667_v10 = vadd.f32 1.0, %v1361_v9 }
 0xc4d   :  { %1362 = vrcp.f32 %v667_v10  ;;  %v679_v19 = vand.u32 2147483648, %v667_v10  ;;  %vm673_vm12 = vweird.f32 %v667_v10  ;;  %v677_v20 = vand.u32 2147483647, %v667_v10 }
 0xc4f   :  { %v680_v22 = vor.u32 1.1754944e-38, %v679_v19  ;;  %vm678_vm14 = vcmp.eq.f32.partialorder %v677_v20, 8.507059e+37 }
 0xc51   :  { %704 = vperm.xlu1 %1312, %v702_v7  }
 0xc53   :  { %v1363_v11 = vpop.eup %1362 }
 0xc54   :  { %v669_v12 = vmul.f32 %v1363_v11, %v667_v10  ;;  %vm674_vm11 = vweird.f32 %v1363_v11 }
 0xc55   :  { %vm675_vm13 = vmor %vm673_vm12, %vm674_vm11  ;;  %vm877_vm12 = vcmask 130048  }
 0xc56   :  { %v670_v13 = vsub.f32 1.0, %v669_v12 }
 0xc58   :  { %v671_v55 = vmul.f32 %v1363_v11, %v670_v13  ;;  %v208_v13 = vsel %vm156_vm5, %v1682_v63, 0.0 }
 0xc5a   :  { %v672_v14 = vadd.f32 %v1363_v11, %v671_v55 }
 0xc5c   :  { %v676_v21 = vsel %vm675_vm13, %v1363_v11, %v672_v14 }
 0xc5d   :  { %v681_v24 = vsel %vm678_vm14, %v680_v22, %v676_v21 }
 0xc5e   :  { %v684_v45 = vmul.f32 %v681_v24, %v627_v27 }
 0xcbb   :  { %v687_v23 = vpop.permute.xlu1 %686 }
 0xcbc   :  { %v689_v26 = vmul.f32 %v687_v23, %v681_v24 }
 0xcbe   :  { %691 = vrot.lane.b32.xlu2 %v689_v26, %s1527_s5 }
 0xcc3   :  { %v705_v31 = vpop.permute.xlu1 %704 }
 0xcc4   :  { %vm706_vm15 = vcmp.eq.s32.totalorder %v705_v31, 1 }
 0xd18   :  { %v692_v28 = vpop.permute.xlu2 %691 }
 0xd19   :  { %v694_v29 = vadd.f32 %v692_v28, %v684_v45 }
 0xd1b   :  { %1364 = vtanh.f32 %v694_v29  ;;  %v708_v0 = vsel %vm706_vm15, %v694_v29, %v627_v27 }
 0xd21   :  { %v1365_v30 = vpop.eup %1364 }
 0xd22   :  { %697 = vrot.lane.b32.xlu0 %v1365_v30, %s1526_s0 }
 0xd94   :  { %v698_v32 = vpop.permute.xlu0 %697 }
 0xd95   :  { %v700_v33 = vmul.f32 %v698_v32, %v681_v24 }
 0xd97   :  { %v707_v34 = vsel %vm706_vm15, %v700_v33, %v626_v60 }
 0xd98   :  { %v711_v35 = vmul.f32 %v1596_v18, %v707_v34  ;;  %v710_v36 = vmul.f32 %v1593_v17, %v707_v34 }
 0xd9a   :  { %717 = vrot.lane.b32.xlu0 %v711_v35, %s1526_s0  ;;  %713 = vrot.lane.b32.xlu2 %v710_v36, %s1527_s5  ;;  %v876_v36 = vld [vmem:[#allocation8 + $0xb8] sm:$0xff] }
 0xd9b   :  { %895 = vmatpush.msra.mxu3 %v876_v36 }
 0xdf4   :  { %v714_v37 = vpop.permute.xlu2 %713 }
 0xe0c   :  { %v718_v38 = vpop.permute.xlu0 %717 }
 0xe0d   :  { %v720_v39 = vsel %vm79_vm2, %v714_v37, %v718_v38  ;;  %v875_v37 = vld [vmem:[#allocation8 + $0xb0] sm:$0xff]  ;;  %v873_v38 = vld [vmem:[#allocation8 + $0xa8] sm:$0xff] }
 0xe0e   :  { %1287 = vmatmul.msk.f32.vlgmr.msra.gmra.mxu1 %vm234_vm3, %v720_v39  ;;  %918 = vmatpush.msra.mxu0 %v873_v38  ;;  %v874_v39 = vld [vmem:[%s1852_s2] sm:$0xf]  ;;  %s1529_s2 = smov 95  }
 0xe0f   :  { %896 = vmatpush.msra.mxu3 %v875_v37 }
 0xe10   :  { %1291 = vmatmul.msk.f32.vlgmr.msra.gmra.mxu3 %vm877_vm12, %v874_v39 }
 0xe8b   :  { %v741_v41 = vpop.f32.mrf.mxu1 }
 0xe8c   :  { %v744_v42 = vadd.f32 %v741_v41, %v199_v53  ;;  %v872_v53 = vld [vmem:[#allocation8 + $0xa0] sm:$0xff]  ;;  %v932_v41 = vld [vmem:[#allocation8 + $0xd8] sm:$0xff] }
 0xe8d   :  { %948 = vmatpush.msrb.mxu1 %v932_v41  ;;  %919 = vmatpush.msra.mxu0 %v872_v53 }
 0xe8e   :  { %1366 = vtanh.f32 %v744_v42  ;;  %v1288_v46 = vmul.f32 -1.442695, %v744_v42  ;;  %v871_v42 = vld [vmem:[#allocation8 + $0x98] sm:$0xff]  ;;  %1015 = vmatpush.msrb.mxu3 %v932_v41 }
 0xe8f   :  { %920 = vmatpush.msra.mxu0 %v871_v42 }
 0xe90   :  { %1368 = vpow2.f32 %v1288_v46  ;;  %v870_v46 = vld [vmem:[#allocation8 + $0x90] sm:$0xff] }
 0xe91   :  { %921 = vmatpush.msra.mxu0 %v870_v46 }
 0xe93   :  { %1085 = vmatpush.msrb.mxu0 %v932_v41 }
 0xe94   :  { %v1367_v43 = vpop.eup %1366 }
 0xe95   :  { %767 = vrot.lane.b32.xlu1 %v1367_v43, %s1526_s0  ;;  %v931_v43 = vld [vmem:[#allocation8 + $0xd0] sm:$0xff] }
 0xe96   :  { %v1369_v48 = vpop.eup %1368  ;;  %949 = vmatpush.msrb.mxu1 %v931_v43  ;;  %1016 = vmatpush.msrb.mxu3 %v931_v43 }
 0xe97   :  { %v748_v49 = vadd.f32 1.0, %v1369_v48  ;;  %1086 = vmatpush.msrb.mxu0 %v931_v43 }
 0xe99   :  { %1370 = vrcp.f32 %v748_v49  ;;  %v760_v54 = vand.u32 2147483648, %v748_v49  ;;  %vm754_vm4 = vweird.f32 %v748_v49  ;;  %v758_v56 = vand.u32 2147483647, %v748_v49 }
 0xe9b   :  { %v761_v58 = vor.u32 1.1754944e-38, %v760_v54  ;;  %vm759_vm7 = vcmp.eq.f32.partialorder %v758_v56, 8.507059e+37  ;;  %v1316_v56 = vld [vmem:[#allocation8 + $0xe0] ss:$0 sm:$0xff] }
 0xe9d   :  { %785 = vperm.xlu1 %1312, %v783_v44   ;;  %v930_v44 = vld [vmem:[#allocation8 + $0xc8] sm:$0xff] }
 0xe9e   :  { %950 = vmatpush.msrb.mxu1 %v930_v44  ;;  %1017 = vmatpush.msrb.mxu3 %v930_v44 }
 0xe9f   :  { %v1371_v40 = vpop.eup %1370  ;;  %1087 = vmatpush.msrb.mxu0 %v930_v44 }
 0xea0   :  { %v750_v50 = vmul.f32 %v1371_v40, %v748_v49  ;;  %vm755_vm1 = vweird.f32 %v1371_v40 }
 0xea1   :  { %vm756_vm6 = vmor %vm754_vm4, %vm755_vm1 }
 0xea2   :  { %v751_v51 = vsub.f32 1.0, %v750_v50 }
 0xea4   :  { %v752_v61 = vmul.f32 %v1371_v40, %v751_v51  ;;  %v929_v51 = vld [vmem:[#allocation8 + $0xc0] sm:$0xff] }
 0xea5   :  { %951 = vmatpush.msrb.mxu1 %v929_v51  ;;  %1018 = vmatpush.msrb.mxu3 %v929_v51 }
 0xea6   :  { %v753_v52 = vadd.f32 %v1371_v40, %v752_v61  ;;  %952 = vmatmul.f32.vlgmr.msrb.gmra.mxu1 %v1525_v16  ;;  %1088 = vmatpush.msrb.mxu0 %v929_v51 }
 0xea7   :  { %1155 = vmatpush.msra.mxu1 %v932_v41 }
 0xea8   :  { %v757_v57 = vsel %vm756_vm6, %v1371_v40, %v753_v52  ;;  %v898_v52 = vpop.f32.mrf.mxu3 }
 0xea9   :  { %v762_v60 = vsel %vm759_vm7, %v761_v58, %v757_v57  ;;  %1156 = vmatpush.msra.mxu1 %v931_v43 }
 0xeaa   :  { %v765_v1 = vmul.f32 %v762_v60, %v708_v0 }
 0xeab   :  { %1157 = vmatpush.msra.mxu1 %v930_v44 }
 0xead   :  { %1158 = vmatpush.msra.mxu1 %v929_v51 }
 0xf07   :  { %v768_v59 = vpop.permute.xlu1 %767 }
 0xf08   :  { %v770_v62 = vmul.f32 %v768_v59, %v762_v60 }
 0xf0a   :  { %772 = vrot.lane.b32.xlu2 %v770_v62, %s1527_s5 }
 0xf0f   :  { %v786_v4 = vpop.permute.xlu1 %785 }
 0xf10   :  { %vm787_vm8 = vcmp.eq.s32.totalorder %v786_v4, 1 }
 0xf23   :  { %v953_v54 = vpop.f32.mrf.mxu1 }
 0xf24   :  { %v957_v59 = vrot.slane %v953_v54, 5 }
 0xf64   :  { %v773_v2 = vpop.permute.xlu2 %772 }
 0xf65   :  { %v775_v47 = vadd.f32 %v773_v2, %v765_v1 }
 0xf67   :  { %1372 = vtanh.f32 %v775_v47  ;;  %v789_v31 = vsel %vm787_vm8, %v775_v47, %v708_v0 }
 0xf6d   :  { %v1373_v3 = vpop.eup %1372 }
 0xf6e   :  { %778 = vrot.lane.b32.xlu0 %v1373_v3, %s1526_s0 }
 0xfe0   :  { %v779_v5 = vpop.permute.xlu0 %778 }
 0xfe1   :  { %v781_v6 = vmul.f32 %v779_v5, %v762_v60 }
 0xfe3   :  { %v1788_v7 = vsel %vm787_vm8, %v781_v6, %v707_v34 }
 0xfe4   :  { %v792_v8 = vmul.f32 %v1596_v18, %v1788_v7  ;;  %v791_v9 = vmul.f32 %v1593_v17, %v1788_v7  ;;  %v864_v17 = vsel %vm863_vm9, 1, %v1528_v15 }
 0xfe6   :  { %798 = vrot.lane.b32.xlu0 %v792_v8, %s1526_s0  ;;  %794 = vrot.lane.b32.xlu2 %v791_v9, %s1527_s5 }
0x1040   :  { %v795_v10 = vpop.permute.xlu2 %794 }
0x1058   :  { %v799_v11 = vpop.permute.xlu0 %798 }
0x1059   :  { %v801_v12 = vsel %vm79_vm2, %v795_v10, %v799_v11 }
0x105a   :  { %1289 = vmatmul.msk.f32.vlgmr.msra.gmra.mxu2 %vm234_vm3, %v801_v12 }
0x10dd   :  { %v822_v55 = vpop.f32.mrf.mxu2 }
0x10de   :  { %v825_v14 = vadd.f32 %v822_v55, %v208_v13 }
0x10e0   :  { %1374 = vtanh.f32 %v825_v14  ;;  %v1290_v19 = vmul.f32 -1.442695, %v825_v14 }
0x10e2   :  { %1376 = vpow2.f32 %v1290_v19 }
0x10e6   :  { %v1375_v18 = vpop.eup %1374 }
0x10e7   :  { %848 = vrot.lane.b32.xlu1 %v1375_v18, %s1526_s0 }
0x10e8   :  { %v1377_v20 = vpop.eup %1376 }
0x10e9   :  { %v829_v21 = vadd.f32 1.0, %v1377_v20 }
0x10eb   :  { %1378 = vrcp.f32 %v829_v21  ;;  %v841_v27 = vand.u32 2147483648, %v829_v21  ;;  %vm835_vm5 = vweird.f32 %v829_v21  ;;  %v839_v45 = vand.u32 2147483647, %v829_v21 }
0x10ed   :  { %v842_v25 = vor.u32 1.1754944e-38, %v841_v27  ;;  %vm840_vm11 = vcmp.eq.f32.partialorder %v839_v45, 8.507059e+37 }
0x10ef   :  { %866 = vperm.xlu1 %1312, %v864_v17  }
0x10f1   :  { %v1379_v22 = vpop.eup %1378 }
0x10f2   :  { %v831_v23 = vmul.f32 %v1379_v22, %v829_v21  ;;  %vm836_vm3 = vweird.f32 %v1379_v22 }
0x10f3   :  { %vm837_vm10 = vmor %vm835_vm5, %vm836_vm3 }
0x10f4   :  { %v832_v24 = vsub.f32 1.0, %v831_v23 }
0x10f6   :  { %v833_v63 = vmul.f32 %v1379_v22, %v832_v24 }
0x10f8   :  { %v834_v26 = vadd.f32 %v1379_v22, %v833_v63 }
0x10fa   :  { %v838_v28 = vsel %vm837_vm10, %v1379_v22, %v834_v26 }
0x10fb   :  { %v843_v29 = vsel %vm840_vm11, %v842_v25, %v838_v28 }
0x10fc   :  { %v846_v32 = vmul.f32 %v843_v29, %v789_v31 }
0x1159   :  { %v849_v15 = vpop.permute.xlu1 %848 }
0x115a   :  { %v851_v30 = vmul.f32 %v849_v15, %v843_v29 }
0x115c   :  { %853 = vrot.lane.b32.xlu2 %v851_v30, %s1527_s5 }
0x1161   :  { %v867_v48 = vpop.permute.xlu1 %866 }
0x1162   :  { %vm868_vm13 = vcmp.eq.s32.totalorder %v867_v48, 1 }
0x11b6   :  { %v854_v33 = vpop.permute.xlu2 %853 }
0x11b7   :  { %v856_v34 = vadd.f32 %v854_v33, %v846_v32 }
0x11b9   :  { %1380 = vtanh.f32 %v856_v34 }
0x11bf   :  { %v1381_v35 = vpop.eup %1380 }
0x11c0   :  { %859 = vrot.lane.b32.xlu0 %v1381_v35, %s1526_s0 }
0x1232   :  { %v860_v49 = vpop.permute.xlu0 %859 }
0x1233   :  { %v862_v40 = vmul.f32 %v860_v49, %v843_v29 }
0x1235   :  { %v1810_v50 = vsel %vm868_vm13, %v862_v40, %v1788_v7 }
0x1236   :  { %902 = vrot.lane.b32.xlu2 %v1810_v50, %s1527_s5 }
0x1290   :  { %v903_v61 = vpop.permute.xlu2 %902 }
0x1291   :  { %1292 = vmatmul.msk.f32.vlgmr.msra.gmra.mxu0 %vm79_vm2, %v903_v61 }
0x130e   :  { %v923_v57 = vpop.f32.mrf.mxu0 }
0x130f   :  { %v924_v58 = vadd.f32 %v923_v57, %v898_v52 }
0x1311   :  { %v1816_v60 = vadd.f32 %v1316_v56, %v924_v58 }
0x1313   :  { %v959_v62 = vadd.f32 %v957_v59, %v1816_v60 }
0x1315   :  { %1382 = vtanh.f32 %v959_v62  ;;  %v1293_v0 = vmul.f32 -1.442695, %v959_v62 }
0x1317   :  { %1384 = vpow2.f32 %v1293_v0 }
0x131b   :  { %v1383_v16 = vpop.eup %1382 }
0x131c   :  { %982 = vrot.lane.b32.xlu0 %v1383_v16, %s1526_s0 }
0x131d   :  { %v1385_v1 = vpop.eup %1384 }
0x131e   :  { %v963_v2 = vadd.f32 1.0, %v1385_v1 }
0x1320   :  { %1386 = vrcp.f32 %v963_v2  ;;  %v975_v7 = vand.u32 2147483648, %v963_v2  ;;  %vm969_vm15 = vweird.f32 %v963_v2  ;;  %v973_v8 = vand.u32 2147483647, %v963_v2 }
0x1322   :  { %v976_v10 = vor.u32 1.1754944e-38, %v975_v7  ;;  %vm974_vm1 = vcmp.eq.f32.partialorder %v973_v8, 8.507059e+37 }
0x1326   :  { %v1387_v47 = vpop.eup %1386 }
0x1327   :  { %v965_v3 = vmul.f32 %v1387_v47, %v963_v2  ;;  %vm970_vm14 = vweird.f32 %v1387_v47 }
0x1328   :  { %vm971_vm0 = vmor %vm969_vm15, %vm970_vm14  ;;  %vm1219_vm15 = vcmask 515072  }
0x1329   :  { %v966_v4 = vsub.f32 1.0, %v965_v3 }
0x132b   :  { %v967_v5 = vmul.f32 %v1387_v47, %v966_v4 }
0x132d   :  { %v968_v6 = vadd.f32 %v1387_v47, %v967_v5 }
0x132f   :  { %v972_v9 = vsel %vm971_vm0, %v1387_v47, %v968_v6  ;;  %vm1221_vm0 = vcmask 777216  }
0x1330   :  { %v977_v12 = vsel %vm974_vm1, %v976_v10, %v972_v9  ;;  %vm1225_vm1 = vcmask 778240  }
0x1331   :  { %v980_v55 = vmul.f32 0.0, %v977_v12 }
0x138e   :  { %v983_v11 = vpop.permute.xlu0 %982 }
0x138f   :  { %v985_v13 = vmul.f32 %v983_v11, %v977_v12 }
0x1391   :  { %987 = vrot.lane.b32.xlu1 %v985_v13, %s1527_s5 }
0x1403   :  { %v988_v14 = vpop.permute.xlu1 %987 }
0x1404   :  { %v990_v18 = vadd.f32 %v988_v14, %v980_v55 }
0x1406   :  { %1388 = vtanh.f32 %v990_v18  ;;  %v1048_v39 = vrot.slane %v990_v18, 1 }
0x140c   :  { %v1389_v17 = vpop.eup %1388 }
0x140d   :  { %993 = vrot.lane.b32.xlu2 %v1389_v17, %s1526_s0 }
0x1467   :  { %v994_v19 = vpop.permute.xlu2 %993 }
0x1468   :  { %v996_v20 = vmul.f32 %v994_v19, %v977_v12 }
0x146a   :  { %v998_v21 = vrot.slane %v996_v20, 3 }
0x146c   :  { %999 = vrot.lane.b32.xlu0 %v998_v21, %s1527_s5 }
0x14de   :  { %v1000_v22 = vpop.permute.xlu0 %999 }
0x14df   :  { %1294 = vmatmul.msk.f32.vlgmr.msrb.gmra.mxu3 %vm79_vm2, %v1000_v22 }
0x1562   :  { %v1020_v23 = vpop.f32.mrf.mxu3 }
0x1563   :  { %v1024_v24 = vrot.slane %v1020_v23, 6 }
0x1565   :  { %v1026_v63 = vadd.f32 %v1024_v24, %v1816_v60 }
0x1567   :  { %1390 = vtanh.f32 %v1026_v63  ;;  %v1295_v27 = vmul.f32 -1.442695, %v1026_v63 }
0x1569   :  { %1392 = vpow2.f32 %v1295_v27 }
0x156d   :  { %v1391_v26 = vpop.eup %1390 }
0x156e   :  { %1052 = vrot.lane.b32.xlu1 %v1391_v26, %s1526_s0 }
0x156f   :  { %v1393_v45 = vpop.eup %1392 }
0x1570   :  { %v1030_v28 = vadd.f32 1.0, %v1393_v45 }
0x1572   :  { %1394 = vrcp.f32 %v1030_v28  ;;  %v1042_v32 = vand.u32 2147483648, %v1030_v28  ;;  %vm1036_vm6 = vweird.f32 %v1030_v28  ;;  %v1040_v33 = vand.u32 2147483647, %v1030_v28 }
0x1574   :  { %v1043_v35 = vor.u32 1.1754944e-38, %v1042_v32  ;;  %vm1041_vm8 = vcmp.eq.f32.partialorder %v1040_v33, 8.507059e+37 }
0x1578   :  { %v1395_v25 = vpop.eup %1394 }
0x1579   :  { %v1032_v15 = vmul.f32 %v1395_v25, %v1030_v28  ;;  %vm1037_vm4 = vweird.f32 %v1395_v25 }
0x157a   :  { %vm1038_vm7 = vmor %vm1036_vm6, %vm1037_vm4 }
0x157b   :  { %v1033_v29 = vsub.f32 1.0, %v1032_v15 }
0x157d   :  { %v1034_v30 = vmul.f32 %v1395_v25, %v1033_v29 }
0x157f   :  { %v1035_v31 = vadd.f32 %v1395_v25, %v1034_v30 }
0x1581   :  { %v1039_v34 = vsel %vm1038_vm7, %v1395_v25, %v1035_v31  ;;  %vm1248_vm7 = vcmask 0  }
0x1582   :  { %v1044_v37 = vsel %vm1041_vm8, %v1043_v35, %v1039_v34 }
0x1583   :  { %v1050_v53 = vmul.f32 %v1048_v39, %v1044_v37 }
0x15e0   :  { %v1053_v36 = vpop.permute.xlu1 %1052 }
0x15e1   :  { %v1055_v38 = vmul.f32 %v1053_v36, %v1044_v37  ;;  %v1214_v36 = vrot.slane %v1810_v50, 4  ;;  %v1223_v50 = vld [vmem:[#allocation8 + $0xe8] sm:$0x1] }
0x15e3   :  { %1057 = vrot.lane.b32.xlu2 %v1055_v38, %s1527_s5 }
0x163d   :  { %v1058_v41 = vpop.permute.xlu2 %1057 }
0x163e   :  { %v1060_v42 = vadd.f32 %v1058_v41, %v1050_v53 }
0x1640   :  { %1396 = vtanh.f32 %v1060_v42  ;;  %v1118_v7 = vrot.slane %v1060_v42, 1 }
0x1646   :  { %v1397_v43 = vpop.eup %1396 }
0x1647   :  { %1063 = vrot.lane.b32.xlu0 %v1397_v43, %s1526_s0 }
0x16b9   :  { %v1064_v44 = vpop.permute.xlu0 %1063 }
0x16ba   :  { %v1066_v46 = vmul.f32 %v1064_v44, %v1044_v37  ;;  %v1317_v37 = vld [vmem:[%s1854_s4] ss:$0 sm:$0xff]  ;;  %s1530_s4 = smov [#allocation9]  }
0x16bb   :  { %s1255_s18 = sshll.u32 %s1530_s4, 4  ;;  %s1256_s18 = int_to_ptr.vmem [resolvable:$true] %s1255_s18 }
0x16bc   :  { %v1068_v48 = vrot.slane %v1066_v46, 2 }
0x16be   :  { %1069 = vrot.lane.b32.xlu1 %v1068_v48, %s1527_s5 }
0x1730   :  { %v1070_v49 = vpop.permute.xlu1 %1069 }
0x1731   :  { %1296 = vmatmul.msk.f32.vlgmr.msrb.gmra.mxu0 %vm79_vm2, %v1070_v49 }
0x17ae   :  { %v1090_v40 = vpop.f32.mrf.mxu0 }
0x17af   :  { %v1094_v51 = vrot.slane %v1090_v40, 7 }
0x17b1   :  { %v1096_v61 = vadd.f32 %v1094_v51, %v1816_v60 }
0x17b3   :  { %1398 = vtanh.f32 %v1096_v61  ;;  %v1297_v54 = vmul.f32 -1.442695, %v1096_v61 }
0x17b5   :  { %1400 = vpow2.f32 %v1297_v54 }
0x17b9   :  { %v1399_v52 = vpop.eup %1398 }
0x17ba   :  { %1122 = vrot.lane.b32.xlu2 %v1399_v52, %s1526_s0 }
0x17bb   :  { %v1401_v56 = vpop.eup %1400 }
0x17bc   :  { %v1100_v57 = vadd.f32 1.0, %v1401_v56 }
0x17be   :  { %1402 = vrcp.f32 %v1100_v57  ;;  %v1112_v1 = vand.u32 2147483648, %v1100_v57  ;;  %vm1106_vm3 = vweird.f32 %v1100_v57  ;;  %v1110_v2 = vand.u32 2147483647, %v1100_v57 }
0x17c0   :  { %v1113_v3 = vor.u32 1.1754944e-38, %v1112_v1  ;;  %vm1111_vm10 = vcmp.eq.f32.partialorder %v1110_v2, 8.507059e+37 }
0x17c4   :  { %v1403_v58 = vpop.eup %1402 }
0x17c5   :  { %v1102_v59 = vmul.f32 %v1403_v58, %v1100_v57  ;;  %vm1107_vm9 = vweird.f32 %v1403_v58 }
0x17c6   :  { %vm1108_vm5 = vmor %vm1106_vm3, %vm1107_vm9 }
0x17c7   :  { %v1103_v62 = vsub.f32 1.0, %v1102_v59 }
0x17c9   :  { %v1104_v16 = vmul.f32 %v1403_v58, %v1103_v62 }
0x17cb   :  { %v1105_v0 = vadd.f32 %v1403_v58, %v1104_v16 }
0x17cd   :  { %v1109_v47 = vsel %vm1108_vm5, %v1403_v58, %v1105_v0 }
0x17ce   :  { %v1114_v5 = vsel %vm1111_vm10, %v1113_v3, %v1109_v47 }
0x17cf   :  { %v1120_v8 = vmul.f32 %v1118_v7, %v1114_v5 }
0x1814   :  { %v1123_v4 = vpop.permute.xlu2 %1122 }
0x1815   :  { %v1125_v6 = vmul.f32 %v1123_v4, %v1114_v5 }
0x1817   :  { %1127 = vrot.lane.b32.xlu0 %v1125_v6, %s1527_s5 }
0x1889   :  { %v1128_v9 = vpop.permute.xlu0 %1127 }
0x188a   :  { %v1130_v10 = vadd.f32 %v1128_v9, %v1120_v8 }
0x188c   :  { %1404 = vtanh.f32 %v1130_v10  ;;  %v1185_v31 = vrot.slane %v1130_v10, 1 }
0x1892   :  { %v1405_v11 = vpop.eup %1404 }
0x1893   :  { %1133 = vrot.lane.b32.xlu1 %v1405_v11, %s1526_s0 }
0x1905   :  { %v1134_v12 = vpop.permute.xlu1 %1133 }
0x1906   :  { %v1136_v13 = vmul.f32 %v1134_v12, %v1114_v5 }
0x1908   :  { %v1138_v55 = vrot.slane %v1136_v13, 1 }
0x190a   :  { %1139 = vrot.lane.b32.xlu2 %v1138_v55, %s1527_s5 }
0x1964   :  { %v1140_v14 = vpop.permute.xlu2 %1139 }
0x1965   :  { %1298 = vmatmul.msk.f32.vlgmr.msra.gmra.mxu1 %vm79_vm2, %v1140_v14 }
0x19e2   :  { %v1160_v18 = vpop.f32.mrf.mxu1 }
0x19e3   :  { %v1163_v17 = vadd.f32 %v1160_v18, %v1816_v60 }
0x19e5   :  { %1406 = vtanh.f32 %v1163_v17  ;;  %v1299_v20 = vmul.f32 -1.442695, %v1163_v17 }
0x19e7   :  { %1408 = vpow2.f32 %v1299_v20 }
0x19eb   :  { %v1407_v19 = vpop.eup %1406 }
0x19ec   :  { %1189 = vrot.lane.b32.xlu0 %v1407_v19, %s1526_s0 }
0x19ed   :  { %v1409_v21 = vpop.eup %1408 }
0x19ee   :  { %v1167_v22 = vadd.f32 1.0, %v1409_v21 }
0x19f0   :  { %1410 = vrcp.f32 %v1167_v22  ;;  %v1179_v45 = vand.u32 2147483648, %v1167_v22  ;;  %vm1173_vm12 = vweird.f32 %v1167_v22  ;;  %v1177_v28 = vand.u32 2147483647, %v1167_v22 }
0x19f2   :  { %v1180_v25 = vor.u32 1.1754944e-38, %v1179_v45  ;;  %vm1178_vm14 = vcmp.eq.f32.partialorder %v1177_v28, 8.507059e+37 }
0x19f6   :  { %v1411_v23 = vpop.eup %1410 }
0x19f7   :  { %v1169_v24 = vmul.f32 %v1411_v23, %v1167_v22  ;;  %vm1174_vm11 = vweird.f32 %v1411_v23 }
0x19f8   :  { %vm1175_vm13 = vmor %vm1173_vm12, %vm1174_vm11 }
0x19f9   :  { %v1170_v63 = vsub.f32 1.0, %v1169_v24 }
0x19fb   :  { %v1171_v26 = vmul.f32 %v1411_v23, %v1170_v63 }
0x19fd   :  { %v1172_v27 = vadd.f32 %v1411_v23, %v1171_v26 }
0x19ff   :  { %v1176_v60 = vsel %vm1175_vm13, %v1411_v23, %v1172_v27 }
0x1a00   :  { %v1181_v29 = vsel %vm1178_vm14, %v1180_v25, %v1176_v60 }
0x1a01   :  { %v1187_v32 = vmul.f32 %v1185_v31, %v1181_v29 }
0x1a5e   :  { %v1190_v15 = vpop.permute.xlu0 %1189 }
0x1a5f   :  { %v1192_v30 = vmul.f32 %v1190_v15, %v1181_v29 }
0x1a61   :  { %1194 = vrot.lane.b32.xlu1 %v1192_v30, %s1527_s5 }
0x1a69   :  { %1211 = vrot.lane.b32.xlu1 %v1317_v37, %s1527_s5 }
0x1ad3   :  { %v1195_v33 = vpop.permute.xlu1 %1194 }
0x1ad4   :  { %v1197_v34 = vadd.f32 %v1195_v33, %v1187_v32 }
0x1ad6   :  { %1412 = vtanh.f32 %v1197_v34 }
0x1adb   :  { %v1212_v53 = vpop.permute.xlu1 %1211 }
0x1adc   :  { %v1413_v35 = vpop.eup %1412 }
0x1add   :  { %1200 = vrot.lane.b32.xlu2 %v1413_v35, %s1526_s0 }
0x1ae5   :  { %1215 = vrot.lane.b32.xlu2 %v1214_v36, %s1529_s2 }
0x1b37   :  { %v1201_v38 = vpop.permute.xlu2 %1200 }
0x1b38   :  { %v1203_v39 = vmul.f32 %v1201_v38, %v1181_v29 }
0x1b3a   :  { %1206 = vrot.lane.b32.xlu0 %v1203_v39, %s1527_s5 }
0x1b3f   :  { %v1216_v42 = vpop.permute.xlu2 %1215 }
0x1bac   :  { %v1207_v41 = vpop.permute.xlu0 %1206 }
0x1bad   :  { %v1218_v43 = vsel %vm79_vm2, %v1207_v41, %v1212_v53 }
0x1bae   :  { %v1220_v44 = vsel %vm1219_vm15, %v1218_v43, %v1216_v42 }
0x1baf   :  { %v1222_v46 = vsel %vm1221_vm0, %v1220_v44, 1.0 }
0x1bb0   :  { %v1224_v48 = vmul.f32 %v1223_v50, %v1222_v46 }
0x1bb2   :  { %v1226_v49 = vsel %vm1225_vm1, %v1224_v48, 0.0 }
0x1bb3   :  { %1227 = vadd.xlane.f32.xlu0 %v1226_v49 }
0x1c26   :  { %v1228_v40 = vpop.xlane.xlu0 %1227 }
0x1c27   :  { %v1300_v51 = vmul.f32 -1.442695, %v1228_v40 }
0x1c29   :  { %1414 = vpow2.f32 %v1300_v51 }
0x1c2f   :  { %v1415_v61 = vpop.eup %1414 }
0x1c30   :  { %v1232_v52 = vadd.f32 1.0, %v1415_v61 }
0x1c32   :  { %1416 = vrcp.f32 %v1232_v52  ;;  %v1244_v58 = vand.u32 2147483648, %v1232_v52  ;;  %v1242_v62 = vand.u32 2147483647, %v1232_v52  ;;  %vm1238_vm2 = vweird.f32 %v1232_v52 }
0x1c34   :  { %v1245_v0 = vor.u32 1.1754944e-38, %v1244_v58  ;;  %vm1243_vm8 = vcmp.eq.f32.partialorder %v1242_v62, 8.507059e+37 }
0x1c38   :  { %v1417_v54 = vpop.eup %1416 }
0x1c39   :  { %v1234_v56 = vmul.f32 %v1417_v54, %v1232_v52  ;;  %vm1239_vm4 = vweird.f32 %v1417_v54 }
0x1c3a   :  { %vm1240_vm6 = vmor %vm1238_vm2, %vm1239_vm4 }
0x1c3b   :  { %v1235_v57 = vsub.f32 1.0, %v1234_v56 }
0x1c3d   :  { %v1236_v59 = vmul.f32 %v1417_v54, %v1235_v57 }
0x1c3f   :  { %v1237_v16 = vadd.f32 %v1417_v54, %v1236_v59 }
0x1c41   :  { %v1241_v1 = vsel %vm1240_vm6, %v1417_v54, %v1237_v16 }
0x1c42   :  { %v1246_v2 = vsel %vm1243_vm8, %v1245_v0, %v1241_v1 }
0x1c43   :  { %1249 = vst.msk [vmem:[#allocation9] sm:$0x1] %vm1248_vm7, %v1246_v2 }
0x1c44   :  { %1260 = dma.vmem_to_hbm [thread:$0]  %s1256_s18, 16, %s1258_s21, [#allocation5]  }
0x1c45   :  { %1518 = dma.done.wait [#allocation5], 16  }
0x1c46   :  { %1519 = vsyncadd [#allocation5], 4294967280 }
0x1c47   :  { %1265 = vsyncpa [#allocation4], 1 }
0x1c48   :  { %1266 = vsyncpa [#allocation7], 1 }
0x1c49   :  { %1267 = vsyncpa [#allocation5], 1 }

</bundles_post_ra>
